<compile_context>
chip_gen: v5e
topology: v5e:2x2
jax: 0.10.0
libtpu: 0.0.40
codegen_flags: <defaults>
</compile_context>

<pallas_src>
import math

import jax
import jax.numpy as jnp
from jax.experimental import pallas as pl
from jax.experimental.pallas import tpu as pltpu


def _round_up(n, m):
    return ((n + m - 1) // m) * m


def _sublane(dtype):
    # Second-minor tiling granularity: 8 rows for 4-byte, 16 for 2-byte dtypes.
    return 8 * max(1, 4 // jnp.dtype(dtype).itemsize)


def _vmem_budget_bytes():
    """Generation-aware scoped-VMEM cap (leaves headroom for Mosaic scratch)."""
    try:
        cap = int(pltpu.get_tpu_info().vmem_capacity_bytes)
    except Exception:
        cap = 64 << 20                      # conservative: v7x-sized VMEM
    if cap <= (64 << 20):
        return 52 << 20                     # v7x (64 MiB physical per TC)
    return 100 << 20                        # v5e / v6e (128 MiB physical)


def _is_megacore():
    """Best-effort detection of dual-TensorCore (v7x-class) chips."""
    try:
        return "v7" in jax.devices()[0].device_kind.lower()
    except Exception:
        return False


# --------------------------------------------------------------------------
# Kernel
# --------------------------------------------------------------------------
def encoder_kernel(x_ref, w1_ref, b1_ref, w2_ref, b2_ref, wh_ref, bh_ref,
                   out_ref, acc_ref):
    """One (batch_tile, k_tile) grid step.

    acc_ref accumulates x @ W1 over the K ("arbitrary", last) grid axis in f32.
    On the last K step: bias + LeakyReLU(0.2) + layer-2 + fused mean/log_var
    head run in f32 and the [tile_b, F_pad] result is written with a single
    lane-dense store.
    """
    k = pl.program_id(1)

    @pl.when(k == 0)
    def _init():
        acc_ref[...] = jnp.zeros_like(acc_ref)

    # Layer 1 (dominant matmul): bf16 operands, f32 accumulation across K tiles.
    acc_ref[...] += jnp.dot(x_ref[...].astype(w1_ref.dtype), w1_ref[...],
                            preferred_element_type=jnp.float32)

    @pl.when(k == pl.num_programs(1) - 1)
    def _finalize():
        h = acc_ref[...] + b1_ref[...]                       # f32
        h = jnp.where(h > 0, h, 0.2 * h)                     # LeakyReLU(0.2)
        # Layer 2 + fused mean/log_var head, fully f32 (tiny vs. layer 1).
        h = jnp.dot(h, w2_ref[...],
                    preferred_element_type=jnp.float32) + b2_ref[...]
        out = jnp.dot(h, wh_ref[...],
                      preferred_element_type=jnp.float32) + bh_ref[...]
        out_ref[...] = out.astype(out_ref.dtype)


# --------------------------------------------------------------------------
# Parameter preparation (one-time, outside the hot path)
# --------------------------------------------------------------------------
def prepare_encoder_params(params, *, tile_k=1024, w1_dtype=jnp.bfloat16):
    """Pad + cast the weights once so forward calls do no HBM layout work.

    Weights are stored [in, out] (transpose of nn.Linear's [out, in]) so the
    kernel computes y = x @ W + b.  Returns device arrays + static metadata.
    """
    input_dim, hidden_dim = params["w1"].shape
    latent_dim = params["wm"].shape[1]

    tile_k = _round_up(min(tile_k, _round_up(input_dim, 128)), 128)
    K_pad = _round_up(input_dim, tile_k)
    H_pad = _round_up(hidden_dim, 128)
    F_pad = _round_up(2 * latent_dim, 128)

    def pad2(a, rows, cols, dtype):
        a = jnp.asarray(a, dtype)
        return jnp.pad(a, ((0, rows - a.shape[0]), (0, cols - a.shape[1])))

    wh = jnp.concatenate([jnp.asarray(params["wm"]),
                          jnp.asarray(params["wv"])], axis=1)
    bh = jnp.concatenate([jnp.asarray(params["bm"]).reshape(1, -1),
                          jnp.asarray(params["bv"]).reshape(1, -1)], axis=1)

    return {
        # big layer-1 weight in bf16 (MXU rate, half the HBM/VMEM traffic)
        "w1": pad2(params["w1"], K_pad, H_pad, w1_dtype),
        "b1": pad2(jnp.asarray(params["b1"]).reshape(1, -1), 1, H_pad, jnp.float32),
        # small layer-2 / head weights kept in f32 for parity with PyTorch
        "w2": pad2(params["w2"], H_pad, H_pad, jnp.float32),
        "b2": pad2(jnp.asarray(params["b2"]).reshape(1, -1), 1, H_pad, jnp.float32),
        "wh": pad2(wh, H_pad, F_pad, jnp.float32),
        "bh": pad2(bh, 1, F_pad, jnp.float32),
        # static metadata (plain Python ints)
        "input_dim": int(input_dim),
        "hidden_dim": int(hidden_dim),
        "latent_dim": int(latent_dim),
        "tile_k": int(tile_k),
    }


# --------------------------------------------------------------------------
# Forward
# --------------------------------------------------------------------------
def _vmem_estimate(tile_b, tile_k, H_pad, F_pad, x_bytes, w1_bytes, out_bytes,
                   const_bufs):
    return (
        2 * tile_b * tile_k * x_bytes                          # x tile (2 bufs)
        + 2 * tile_k * H_pad * w1_bytes                        # w1 slice (2 bufs)
        + const_bufs * (H_pad * H_pad + H_pad * F_pad) * 4     # w2 + head W (f32)
        + const_bufs * (2 * H_pad + F_pad) * 4                 # biases (f32)
        + 2 * tile_b * F_pad * out_bytes                       # out tile (2 bufs)
        + tile_b * H_pad * 4                                   # f32 accumulator
    )


def encoder_forward(x, prep, *, tile_b=None):
    """Encoder forward (VAE=True path). Returns (mean, log_var), [B, latent]."""
    B, input_dim = x.shape
    assert input_dim == prep["input_dim"], "x feature dim != prepared params"
    latent_dim = prep["latent_dim"]
    tile_k = prep["tile_k"]
    K_pad, H_pad = prep["w1"].shape
    F_pad = prep["wh"].shape[1]
    out_dtype = x.dtype

    sub = max(_sublane(x.dtype), _sublane(out_dtype))
    budget = _vmem_budget_bytes()
    const_bufs = 1                      # constants use pl.Buffered(1)

    def est(tb):
        return _vmem_estimate(tb, tile_k, H_pad, F_pad,
                              jnp.dtype(x.dtype).itemsize,
                              jnp.dtype(prep["w1"].dtype).itemsize,
                              jnp.dtype(out_dtype).itemsize, const_bufs)

    B_ceil = _round_up(B, sub)
    if tile_b is None:
        # Single-TC chips: one fat batch tile maximises W1 reuse (it streams
        # from HBM once).  v7x megacore: keep exactly 2 tiles so both TCs work.
        if _is_megacore() and B_ceil >= 2 * sub:
            tile_b = _round_up(-(-B_ceil // 2), sub)
        else:
            tile_b = B_ceil
        tile_b = min(tile_b, 1024)
        while tile_b > sub and est(tile_b) > budget:
            tile_b = _round_up(tile_b // 2, sub)
    else:
        tile_b = _round_up(min(tile_b, B_ceil), sub)

    B_pad = _round_up(B, tile_b)
    vmem_bytes = est(tile_b)
    # Never clamp below computed usage; cap per generation.
    vmem_limit = int(max(vmem_bytes + (4 << 20),
                         min(vmem_bytes + (8 << 20), budget)))

    # Pad x only when needed (zero padding is numerically exact); the bf16
    # cast happens in-register inside the kernel, not in HBM.
    if (B_pad, K_pad) != x.shape:
        x_p = jnp.pad(x, ((0, B_pad - B), (0, K_pad - input_dim)))
    else:
        x_p = x

    grid = (B_pad // tile_b, K_pad // tile_k)   # (batch, reduction-last)

    const = pl.Buffered(1)   # fetched once (index_map constant) -> single buffer
    in_specs = [
        pl.BlockSpec((tile_b, tile_k), lambda i, k: (i, k)),                    # x
        pl.BlockSpec((tile_k, H_pad), lambda i, k: (k, 0)),                     # w1
        pl.BlockSpec((1, H_pad), lambda i, k: (0, 0), pipeline_mode=const),     # b1
        pl.BlockSpec((H_pad, H_pad), lambda i, k: (0, 0), pipeline_mode=const),  # w2
        pl.BlockSpec((1, H_pad), lambda i, k: (0, 0), pipeline_mode=const),     # b2
        pl.BlockSpec((H_pad, F_pad), lambda i, k: (0, 0), pipeline_mode=const),  # head W
        pl.BlockSpec((1, F_pad), lambda i, k: (0, 0), pipeline_mode=const),     # head b
    ]
    out_specs = pl.BlockSpec((tile_b, F_pad), lambda i, k: (i, 0))

    fused = pl.pallas_call(
        encoder_kernel,
        out_shape=jax.ShapeDtypeStruct((B_pad, F_pad), out_dtype),
        grid=grid,
        in_specs=in_specs,
        out_specs=out_specs,
        scratch_shapes=[pltpu.VMEM((tile_b, H_pad), jnp.float32)],
        compiler_params=pltpu.CompilerParams(
            dimension_semantics=("parallel", "arbitrary"),
            vmem_limit_bytes=vmem_limit),
    )(x_p, prep["w1"], prep["b1"], prep["w2"], prep["b2"],
      prep["wh"], prep["bh"])

    mean = fused[:B, :latent_dim]
    log_var = fused[:B, latent_dim:2 * latent_dim]
    return mean, log_var


# --------------------------------------------------------------------------
# Init + reference
# --------------------------------------------------------------------------
def init_encoder_params(key, input_dim, latent_dim, hidden_dim,
                        dtype=jnp.float32):
    """Deterministic synthetic init (uniform, PyTorch-Linear-like fan-in scaling).

    Weights are stored [in, out]; biases [1, out]."""
    def linear(k, fan_in, fan_out):
        kw, kb = jax.random.split(k)
        bound = 1.0 / math.sqrt(fan_in)
        w = jax.random.uniform(kw, (fan_in, fan_out), dtype, -bound, bound)
        b = jax.random.uniform(kb, (1, fan_out), dtype, -bound, bound)
        return w, b

    k1, k2, k3, k4 = jax.random.split(key, 4)
    w1, b1 = linear(k1, input_dim, hidden_dim)
    w2, b2 = linear(k2, hidden_dim, hidden_dim)
    wm, bm = linear(k3, hidden_dim, latent_dim)
    wv, bv = linear(k4, hidden_dim, latent_dim)
    return {"w1": w1, "b1": b1, "w2": w2, "b2": b2,
            "wm": wm, "bm": bm, "wv": wv, "bv": bv}


def encoder_reference(x, p, layer1_dtype=jnp.float32):
    """Pure-JAX reference; layer1_dtype emulates the kernel's mixed precision."""
    f32 = jnp.float32
    h = jnp.dot(x.astype(layer1_dtype), p["w1"].astype(layer1_dtype),
                preferred_element_type=f32) + p["b1"]
    h = jnp.where(h > 0, h, 0.2 * h)
    h = jnp.dot(h, p["w2"].astype(f32), preferred_element_type=f32) + p["b2"]
    mean = jnp.dot(h, p["wm"].astype(f32), preferred_element_type=f32) + p["bm"]
    log_var = jnp.dot(h, p["wv"].astype(f32), preferred_element_type=f32) + p["bv"]
    return mean, log_var


if __name__ == "__main__":
    # Small but representative: 2 batch tiles of 256 (grid > 1 => pipelined
    # x/out DMAs + dual-TC sharding) and 3 K-steps of 128 (exercises the f32
    # accumulator path).
    B, input_dim, hidden_dim, latent_dim = 512, 300, 96, 24

    key = jax.random.PRNGKey(0)
    kx, kp = jax.random.split(key)
    x = jax.random.normal(kx, (B, input_dim), jnp.float32)
    params = init_encoder_params(kp, input_dim, latent_dim, hidden_dim)

    # Weight layout prep happens ONCE, outside the hot path.
    prep = prepare_encoder_params(params, tile_k=128)

    mean, log_var = encoder_forward(x, prep, tile_b=256)
    jax.block_until_ready((mean, log_var))
    assert mean.shape == (B, latent_dim) and log_var.shape == (B, latent_dim)

    # Primary check: reference with the same mixed precision (bf16 layer-1
    # operands, f32 accumulation, f32 layer-2/head).
    ref_mean, ref_lv = encoder_reference(x, params, layer1_dtype=jnp.bfloat16)
    assert jnp.allclose(mean, ref_mean, atol=5e-3, rtol=5e-3), \
        float(jnp.max(jnp.abs(mean - ref_mean)))
    assert jnp.allclose(log_var, ref_lv, atol=5e-3, rtol=5e-3), \
        float(jnp.max(jnp.abs(log_var - ref_lv)))

    # Sanity check vs the pure-f32 reference (loose: layer 1 runs in bf16).
    f32_mean, f32_lv = encoder_reference(x, params, layer1_dtype=jnp.float32)
    assert jnp.allclose(mean, f32_mean, atol=1e-1, rtol=1e-1)
    assert jnp.allclose(log_var, f32_lv, atol=1e-1, rtol=1e-1)

    # Also exercise the auto-tiling (generation-aware tile_b) path.
    mean2, lv2 = encoder_forward(x, prep)
    jax.block_until_ready((mean2, lv2))
    assert jnp.allclose(mean2, mean, atol=1e-5, rtol=1e-5)
    assert jnp.allclose(lv2, log_var, atol=1e-5, rtol=1e-5)

    print("KERNEL_OK")
</pallas_src>

<mosaic_0001>
module attributes {stable_mosaic.version = 11 : i64} {
  func.func @encoder_kernel(%arg0: i32, %arg1: i32, %arg2: memref<256x128xf32, #tpu.memory_space<vmem>>, %arg3: memref<128x128xbf16, #tpu.memory_space<vmem>>, %arg4: memref<1x128xf32, #tpu.memory_space<vmem>>, %arg5: memref<128x128xf32, #tpu.memory_space<vmem>>, %arg6: memref<1x128xf32, #tpu.memory_space<vmem>>, %arg7: memref<128x128xf32, #tpu.memory_space<vmem>>, %arg8: memref<1x128xf32, #tpu.memory_space<vmem>>, %arg9: memref<256x128xf32, #tpu.memory_space<vmem>>, %arg10: memref<256x128xf32, #tpu.memory_space<vmem>>) attributes {dimension_semantics = [#tpu.dimension_semantics<parallel>, #tpu.dimension_semantics<arbitrary>], iteration_bounds = array<i64: 2, 3>, scalar_prefetch = 0 : i64, scratch_operands = 1 : i64, tpu.core_type = #tpu.core_type<tc>, window_params = [{transform_indices = @transform_0, window_bounds = array<i64: 256, 128>}, {transform_indices = @transform_1, window_bounds = array<i64: 128, 128>}, {pipeline_mode = #tpu.pipeline_mode<synchronous>, transform_indices = @transform_2, window_bounds = array<i64: 1, 128>}, {pipeline_mode = #tpu.pipeline_mode<synchronous>, transform_indices = @transform_3, window_bounds = array<i64: 128, 128>}, {pipeline_mode = #tpu.pipeline_mode<synchronous>, transform_indices = @transform_4, window_bounds = array<i64: 1, 128>}, {pipeline_mode = #tpu.pipeline_mode<synchronous>, transform_indices = @transform_5, window_bounds = array<i64: 128, 128>}, {pipeline_mode = #tpu.pipeline_mode<synchronous>, transform_indices = @transform_6, window_bounds = array<i64: 1, 128>}, {transform_indices = @transform_7, window_bounds = array<i64: 256, 128>}]} {
    %c0_i32 = arith.constant 0 : i32
    %0 = arith.cmpi eq, %arg1, %c0_i32 : i32
    %1 = arith.extui %0 : i1 to i32
    %c0_i32_0 = arith.constant 0 : i32
    %2 = arith.cmpi ne, %1, %c0_i32_0 : i32
    scf.if %2 {
      %cst_9 = arith.constant 0.000000e+00 : f32
      %13 = vector.broadcast %cst_9 : f32 to vector<256x128xf32>
      %c0_10 = arith.constant 0 : index
      %c0_11 = arith.constant 0 : index
      %14 = vector.load %arg10[%c0_10, %c0_11] : memref<256x128xf32, #tpu.memory_space<vmem>>, vector<256x128xf32>
      tpu.vector_store %arg10[%c0_10, %c0_11], %13 {strides = array<i32>} : memref<256x128xf32, #tpu.memory_space<vmem>>, vector<256x128xf32>,
    } else {
    }
    %c0 = arith.constant 0 : index
    %c0_1 = arith.constant 0 : index
    %3 = vector.load %arg10[%c0, %c0_1] : memref<256x128xf32, #tpu.memory_space<vmem>>, vector<256x128xf32>
    %c0_2 = arith.constant 0 : index
    %c0_3 = arith.constant 0 : index
    %4 = vector.load %arg2[%c0_2, %c0_3] : memref<256x128xf32, #tpu.memory_space<vmem>>, vector<256x128xf32>
    %5 = arith.truncf %4 : vector<256x128xf32> to vector<256x128xbf16>
    %c0_4 = arith.constant 0 : index
    %c0_5 = arith.constant 0 : index
    %6 = vector.load %arg3[%c0_4, %c0_5] : memref<128x128xbf16, #tpu.memory_space<vmem>>, vector<128x128xbf16>
    %cst = arith.constant dense<0.000000e+00> : vector<256x128xf32>
    %7 = tpu.matmul %5, %6, %cst {dimension_numbers = #tpu.dot_dimension_numbers<[1], [0], [0], [1], [0, 0, 1, 1], [], []>} : vector<256x128xbf16>, vector<128x128xbf16>, vector<256x128xf32> -> vector<256x128xf32>
    %8 = arith.addf %3, %7 : vector<256x128xf32>
    %c0_6 = arith.constant 0 : index
    %c0_7 = arith.constant 0 : index
    %9 = vector.load %arg10[%c0_6, %c0_7] : memref<256x128xf32, #tpu.memory_space<vmem>>, vector<256x128xf32>
    tpu.vector_store %arg10[%c0_6, %c0_7], %8 {strides = array<i32>} : memref<256x128xf32, #tpu.memory_space<vmem>>, vector<256x128xf32>,
    %c2_i32 = arith.constant 2 : i32
    %10 = arith.cmpi eq, %arg1, %c2_i32 : i32
    %11 = arith.extui %10 : i1 to i32
    %c0_i32_8 = arith.constant 0 : i32
    %12 = arith.cmpi ne, %11, %c0_i32_8 : i32
    scf.if %12 {
      %c0_9 = arith.constant 0 : index
      %c0_10 = arith.constant 0 : index
      %13 = vector.load %arg10[%c0_9, %c0_10] : memref<256x128xf32, #tpu.memory_space<vmem>>, vector<256x128xf32>
      %c0_11 = arith.constant 0 : index
      %c0_12 = arith.constant 0 : index
      %14 = vector.load %arg4[%c0_11, %c0_12] : memref<1x128xf32, #tpu.memory_space<vmem>>, vector<1x128xf32>
      %15 = vector.broadcast %14 : vector<1x128xf32> to vector<256x128xf32>
      %16 = arith.addf %13, %15 : vector<256x128xf32>
      %cst_13 = arith.constant 0.000000e+00 : f32
      %17 = vector.broadcast %cst_13 : f32 to vector<256x128xf32>
      %18 = arith.cmpf ogt, %16, %17 : vector<256x128xf32>
      %cst_14 = arith.constant 2.000000e-01 : f32
      %19 = vector.broadcast %cst_14 : f32 to vector<256x128xf32>
      %20 = arith.mulf %19, %16 : vector<256x128xf32>
      %21 = arith.select %18, %16, %20 : vector<256x128xi1>, vector<256x128xf32>
      %c0_15 = arith.constant 0 : index
      %c0_16 = arith.constant 0 : index
      %22 = vector.load %arg5[%c0_15, %c0_16] : memref<128x128xf32, #tpu.memory_space<vmem>>, vector<128x128xf32>
      %cst_17 = arith.constant dense<0.000000e+00> : vector<256x128xf32>
      %23 = tpu.matmul %21, %22, %cst_17 {dimension_numbers = #tpu.dot_dimension_numbers<[1], [0], [0], [1], [0, 0, 1, 1], [], []>} : vector<256x128xf32>, vector<128x128xf32>, vector<256x128xf32> -> vector<256x128xf32>
      %c0_18 = arith.constant 0 : index
      %c0_19 = arith.constant 0 : index
      %24 = vector.load %arg6[%c0_18, %c0_19] : memref<1x128xf32, #tpu.memory_space<vmem>>, vector<1x128xf32>
      %25 = vector.broadcast %24 : vector<1x128xf32> to vector<256x128xf32>
      %26 = arith.addf %23, %25 : vector<256x128xf32>
      %c0_20 = arith.constant 0 : index
      %c0_21 = arith.constant 0 : index
      %27 = vector.load %arg7[%c0_20, %c0_21] : memref<128x128xf32, #tpu.memory_space<vmem>>, vector<128x128xf32>
      %cst_22 = arith.constant dense<0.000000e+00> : vector<256x128xf32>
      %28 = tpu.matmul %26, %27, %cst_22 {dimension_numbers = #tpu.dot_dimension_numbers<[1], [0], [0], [1], [0, 0, 1, 1], [], []>} : vector<256x128xf32>, vector<128x128xf32>, vector<256x128xf32> -> vector<256x128xf32>
      %c0_23 = arith.constant 0 : index
      %c0_24 = arith.constant 0 : index
      %29 = vector.load %arg8[%c0_23, %c0_24] : memref<1x128xf32, #tpu.memory_space<vmem>>, vector<1x128xf32>
      %30 = vector.broadcast %29 : vector<1x128xf32> to vector<256x128xf32>
      %31 = arith.addf %28, %30 : vector<256x128xf32>
      %c0_25 = arith.constant 0 : index
      %c0_26 = arith.constant 0 : index
      %32 = vector.load %arg9[%c0_25, %c0_26] : memref<256x128xf32, #tpu.memory_space<vmem>>, vector<256x128xf32>
      tpu.vector_store %arg9[%c0_25, %c0_26], %31 {strides = array<i32>} : memref<256x128xf32, #tpu.memory_space<vmem>>, vector<256x128xf32>,
    } else {
    }
    return
  }
  func.func @transform_0(%arg0: i32, %arg1: i32) -> (i32, i32) {
    %c0_i32 = arith.constant 0 : i32
    return %arg0, %arg1 : i32, i32
  }
  func.func @transform_1(%arg0: i32, %arg1: i32) -> (i32, i32) {
    %c0_i32 = arith.constant 0 : i32
    %c0_i32_0 = arith.constant 0 : i32
    return %arg1, %c0_i32 : i32, i32
  }
  func.func @transform_2(%arg0: i32, %arg1: i32) -> (i32, i32) {
    %c0_i32 = arith.constant 0 : i32
    %c0_i32_0 = arith.constant 0 : i32
    %c0_i32_1 = arith.constant 0 : i32
    return %c0_i32, %c0_i32_0 : i32, i32
  }
  func.func @transform_3(%arg0: i32, %arg1: i32) -> (i32, i32) {
    %c0_i32 = arith.constant 0 : i32
    %c0_i32_0 = arith.constant 0 : i32
    %c0_i32_1 = arith.constant 0 : i32
    return %c0_i32, %c0_i32_0 : i32, i32
  }
  func.func @transform_4(%arg0: i32, %arg1: i32) -> (i32, i32) {
    %c0_i32 = arith.constant 0 : i32
    %c0_i32_0 = arith.constant 0 : i32
    %c0_i32_1 = arith.constant 0 : i32
    return %c0_i32, %c0_i32_0 : i32, i32
  }
  func.func @transform_5(%arg0: i32, %arg1: i32) -> (i32, i32) {
    %c0_i32 = arith.constant 0 : i32
    %c0_i32_0 = arith.constant 0 : i32
    %c0_i32_1 = arith.constant 0 : i32
    return %c0_i32, %c0_i32_0 : i32, i32
  }
  func.func @transform_6(%arg0: i32, %arg1: i32) -> (i32, i32) {
    %c0_i32 = arith.constant 0 : i32
    %c0_i32_0 = arith.constant 0 : i32
    %c0_i32_1 = arith.constant 0 : i32
    return %c0_i32, %c0_i32_0 : i32, i32
  }
  func.func @transform_7(%arg0: i32, %arg1: i32) -> (i32, i32) {
    %c0_i32 = arith.constant 0 : i32
    %c0_i32_0 = arith.constant 0 : i32
    return %arg0, %c0_i32 : i32, i32
  }
}

</mosaic_0001>

<bundles_post_ra>
// kernel: tpu_custom_call.1
= control target key start
LH: loop header
LB: loop body
LE: loop exit
PB: predicated region body
PF: predicated region fallthrough
CT: control target
= control target key end

     0   :  { %s2423_s0 = inlined_call_operand.hbm [shape: f32[512,384], index: 0, kind: input, shape index: {}]   ;;  %s2424_s1 = inlined_call_operand.hbm [shape: bf16[384,128], index: 1, kind: input, shape index: {}]   ;;  %s2425_s2 = inlined_call_operand.vmem [shape: f32[1,128], index: 2, kind: input, shape index: {}]   ;;  %s2426_s3 = inlined_call_operand.hbm [shape: f32[128,128], index: 3, kind: input, shape index: {}]   ;;  %s2427_s4 = inlined_call_operand.vmem [shape: f32[1,128], index: 4, kind: input, shape index: {}]   ;;  %s2428_s5 = inlined_call_operand.hbm [shape: f32[128,128], index: 5, kind: input, shape index: {}]   ;;  %s2429_s6 = inlined_call_operand.vmem [shape: f32[1,128], index: 6, kind: input, shape index: {}]   ;;  %s2430_s7 = inlined_call_operand.hbm [shape: f32[512,128], index: 7, kind: output, shape index: {}]  }
   0x1   :  { %2443 = sst [smem:[#allocation28_spill]] %s2423_s0 }
   0x2   :  { %2444 = sst [smem:[#allocation29_spill]] %s2425_s2 }
   0x3   :  { %2445 = sst [smem:[#allocation30_spill]] %s2426_s3 }
   0x4   :  { %2446 = sst [smem:[#allocation31_spill]] %s2427_s4 }
   0x5   :  { %2447 = sst [smem:[#allocation32_spill]] %s2428_s5 }
   0x6   :  { %2448 = sst [smem:[#allocation33_spill]] %s2429_s6 }
   0x7   :  { %2449 = sst [smem:[#allocation34_spill]] %s2430_s7 }
   0x8   :  { %12 = vsyncpa [#allocation4], 0 }
   0x9   :  { %14 = vsyncpa [#allocation4 + $0x1], 0 }
   0xa   :  { %15 = vsyncpa [#allocation7], 0 }
   0xb   :  { %17 = vsyncpa [#allocation7 + $0x1], 0 }
   0xc   :  { %18 = vsyncpa [#allocation10], 0 }
   0xd   :  { %19 = vsyncpa [#allocation5], 0 }
   0xe   :  { %21 = vsyncpa [#allocation5 + $0x1], 0  ;;  %s1954_s24 = smov 0   ;;  %s1956_s25 = smov 0  }
   0xf   :  { %s1958_s26 = smov 0   ;;  %s1960_s27 = smov 0  }
  0x10   :  { %s1962_s28 = smov 0   ;;  %s1964_s29 = smov 0  }
  0x11   :  { %s1966_s30 = smov 0   ;;  %s1968_s8 = smov 0  }
  0x12   :  { %s1970_s9 = smov 0   ;;  %s1972_s10 = smov 0  }
  0x13   :  { %s1974_s11 = smov 0   ;;  %s1976_s12 = smov 0  }
  0x14   :  { %s1978_s13 = smov 0   ;;  %s1980_s14 = smov 0  }
  0x15 LB: > { %2450 = sst [smem:[#allocation17_spill]] %s1850_s24  ;;  %s2021_s15 = sadd.s32 4294967295, %s1902_s14   ;;  %s1902_s14 = sphi %s1980_s14, %s27_s14   ;;  %s1898_s13 = sphi %s1978_s13, %s2489_s13   ;;  %s1894_s12 = sphi %s1976_s12, %s2498_s12   ;;  %s1890_s11 = sphi %s1974_s11, %s2487_s11   ;;  %s1886_s10 = sphi %s1972_s10, %s2497_s10   ;;  %s1882_s9 = sphi %s1970_s9, %s2486_s9   ;;  %s1878_s8 = sphi %s1968_s8, %s2496_s8   ;;  %s1874_s30 = sphi %s1966_s30, %s2495_s30   ;;  %s1870_s29 = sphi %s1964_s29, %s2494_s29   ;;  %s1866_s28 = sphi %s1962_s28, %s2493_s28   ;;  %s1862_s27 = sphi %s1960_s27, %s2492_s27   ;;  %s1858_s26 = sphi %s1958_s26, %s2484_s26   ;;  %s1854_s25 = sphi %s1956_s25, %s2491_s25   ;;  %s1850_s24 = sphi %s1954_s24, %s2490_s24  }
  0x16   : > { %2451 = sst [smem:[#allocation18_spill]] %s1858_s26  ;;  %s1337_s16 = sadd.s32 4294967294, %s1902_s14  }
  0x17   : > { %2452 = sst [smem:[#allocation19_spill]] %s1882_s9  ;;  %p61_p0 = scmp.ne.s32.totalorder %s1878_s8, %s1874_s30 }
  0x18   : > { %2453 = sst [smem:[#allocation20_spill]] %s1890_s11  ;;  %p62_p1 = scmp.eq.s32.totalorder %s2021_s15, 0 }
  0x19   : > { %2454 = sst [smem:[#allocation21_spill]] %s1898_s13  ;;  %p87_p2 = scmp.ne.s32.totalorder %s1866_s28, %s1862_s27 }
  0x1a   : > { %p2030_p3 = por %p62_p1, %p61_p0  ;;  %p215_p4 = scmp.ne.s32.totalorder %s1858_s26, %s1854_s25 }
  0x1b   : > { %p2038_p5 = por %p87_p2, %p62_p1  ;;  %p216_p6 = scmp.eq.s32.totalorder %s2021_s15, 5 }
  0x1c   : > { %p221_p7 = scmp.ne.s32.totalorder %s1854_s25, %s1850_s24  ;;  %p222_p8 = scmp.eq.s32.totalorder %s1337_s16, 5 }
  0x1d   : > { %p2045_p9 = por %p216_p6, %p215_p4  ;;  %p1338_p10 = scmp.ge.s32.totalorder %s1902_s14, 1 }
  0x1e   : > { %p2050_p11 = por %p222_p8, %p221_p7  ;;  %p229_p12 = scmp.lt.s32.totalorder %s1902_s14, 7 }
  0x1f   : > { %s2457_s20 = scalar_select %p2045_p9, 1, 0 }
  0x20   : > { %s2459_s21 = scalar_select %p2050_p11, 1, 0 }
  0x21   : > { %2458 = sst [smem:[#allocation22_spill]] %s2457_s20  ;;  %p2058_p13 = pnand %p1338_p10, %p229_p12 }
  0x22   : > { %2460 = sst [smem:[#allocation23_spill]] %s2459_s21  ;;  %s1904_s16 = smov [#allocation8]  }
  0x23   : > { %s2461_s3 = sld [smem:[#allocation30_spill]]  ;;  %p1475_p0 = pneg %p2058_p13 }
  0x24   : > { %s245_s17 = sshll.u32 %s1904_s16, 4  ;;  %s2463_s5 = sld [smem:[#allocation32_spill]]  ;;  %s246_s17 = int_to_ptr.vmem [resolvable:$true] %s245_s17 }
  0x25   : > { %p1476_p2 = pnand %p1475_p0, %p62_p1  ;;  %s2434_s21 = smov 128  }
  0x26   : > { %s2435_s24 = smov 8   ;;  %s1907_s16 = smov [#allocation9]  }
  0x27   : > { %s262_s7 = sshll.u32 %s1907_s16, 4  ;;  %s36_s22 = sadd.s32 1, %s1894_s12  ;;  %s263_s7 = int_to_ptr.vmem [resolvable:$true] %s262_s7 }
  0x28   : > { %s39_s23 = sadd.s32 1, %s1898_s13  ;;  %p37_p4 = scmp.ge.s32.totalorder %s36_s22, 3 }
  0x29   : > { %s243_s27 = sshll.u32 %s2461_s3, 4  ;;  %p55_p6 = scmp.ne.s32.totalorder %s1882_s9, %s1878_s8  ;;  %s244_s27 = int_to_ptr.hbm [resolvable:$true] %s243_s27 }
  0x2a   : > { %s260_s3 = sshll.u32 %s2463_s5, 4  ;;  %s48_s5 = sadd.s32 1, %s1882_s9  ;;  %s261_s3 = int_to_ptr.hbm [resolvable:$true] %s260_s3 }
  0x2b   : > { %1478 = dma.hbm_to_vmem [thread:$0]  (!%p1476_p2), %s244_s27, 2048, %s246_s17, [#allocation7], %s2434_s21, %s2434_s21, %s2435_s24  }
  0x2c   : > { %1481 = dma.hbm_to_vmem [thread:$0]  (!%p1476_p2), %s261_s3, 2048, %s263_s7, [#allocation10], %s2434_s21, %s2434_s21, %s2435_s24  }
  0x2d   : > { %p56_p7 = scmp.eq.s32.totalorder %s1902_s14, 0  ;;  %s2500_s22 = smov (%p37_p4, %s36_s22), 0 }
  0x2e   : > { %2464 = sst [smem:[#allocation24_spill]] %s2500_s22  ;;  %s2502_s23 = smov (!%p37_p4, %s39_s23), %s1898_s13 }
  0x2f   : > { %s2086_s17 = ssub.s32 %s1894_s12, %s2500_s22  ;;  %p2090_p8 = por %p56_p7, %p55_p6 }
  0x30   : > { %p41_p10 = scmp.ge.s32.totalorder %s2502_s23, 2  ;;  %p72_p12 = scmp.eq.s32.totalorder %s2086_s17, 0 }
  0x31   : > { %p1495_p0 = scmp.lt.s32.totalorder %s1902_s14, 6  ;;  %s279_s7 = sand.u32 1, %s1882_s9  }
  0x32   : > { %s2504_s23 = smov (%p41_p10, %s2502_s23), 0  ;;  %s1342_s27 = sshll.u32 %s279_s7, 8 }
  0x33   : > { %2466 = sst [smem:[#allocation25_spill]] %s2504_s23  ;;  %s43_s16 = ssub.s32 %s1898_s13, %s2504_s23 }
  0x34   : > { %s45_s21 = sor.u32 %s2086_s17, %s43_s16  ;;  %p203_p2 = scmp.eq.s32.totalorder %s43_s16, 0 }
  0x35   : > { %p46_p4 = scmp.eq.s32.totalorder %s45_s21, 0  ;;  %s1460_s24 = smul.u32 96, %s1898_s13 }
  0x36   : > { %s2467_s22 = sadd.s32 1, %s1858_s26  ;;  %s283_s4 = scalar_lea.vmem [#allocation3], %s1342_s27 }
  0x37   : > { %s2106_s20 = scalar_select %p203_p2, %s1858_s26, %s2467_s22  }
  0x38   : > { %s2109_s11 = scalar_select %p46_p4, %s1882_s9, %s48_s5  }
  0x39   : > { %2468 = sst [smem:[#allocation26_spill]] %s2106_s20  ;;  %s288_s6 = sadd.s32 %s1894_s12, %s1460_s24 }
  0x3a   : > { %2469 = sst [smem:[#allocation27_spill]] %s2109_s11  ;;  %s293_s23 = sshll.u32 %s283_s4, 4  ;;  %s294_s23 = int_to_ptr.vmem [resolvable:$true] %s293_s23 }
  0x3b   : > { %s1345_s2 = sshll.u32 %s288_s6, 3  ;;  %s2470_s0 = sld [smem:[#allocation28_spill]] }
  0x3c   : > { %p1483_p6 = pnand %p1495_p0, %p2090_p8  ;;  %s280_s5 = scalar_lea.sflag [#allocation4], %s279_s7 }
  0x3d   : > { %s1908_s11 = smov 384   ;;  %s2471_s9 = smov 8  }
  0x3e   : > { %s2472_s24 = smov 128   ;;  %s303_s27 = sand.u32 1, %s1902_s14  }
  0x3f   : > { %s74_s4 = sadd.s32 1, %s1870_s29  ;;  %p81_p10 = scmp.ne.s32.totalorder %s1870_s29, %s1866_s28 }
  0x40   : > { %s2128_s6 = scalar_select %p72_p12, %s1870_s29, %s74_s4  }
  0x41   : > { %s290_s13 = scalar_lea.hbm %s2470_s0, %s1345_s2  ;;  %p83_p2 = por %p81_p10, %p56_p7 }
  0x42   : > { %s291_s22 = sshll.u32 %s290_s13, 4  ;;  %s305_s2 = sand.u32 1, %s1870_s29   ;;  %s292_s22 = int_to_ptr.hbm [resolvable:$true] %s291_s22 }
  0x43   : > { %1485 = dma.hbm_to_vmem [thread:$0]  (!%p1483_p6), %s292_s22, 4096, %s294_s23, %s280_s5, %s1908_s11, %s2472_s24, %s2471_s9  }
  0x44   : > { %s1346_s3 = sshll.u32 %s305_s2, 6  ;;  %s1394_s21 = sshll.u32 %s1894_s12, 6 }
  0x45   : > { %s312_s7 = scalar_lea.hbm %s2424_s1, %s1394_s21  ;;  %s307_s20 = scalar_lea.vmem [#allocation6], %s1346_s3 }
  0x46   : > { %s313_s0 = sshll.u32 %s312_s7, 4  ;;  %s315_s26 = sshll.u32 %s307_s20, 4  ;;  %s314_s0 = int_to_ptr.hbm [resolvable:$true] %s313_s0  ;;  %s316_s26 = int_to_ptr.vmem [resolvable:$true] %s315_s26 }
  0x47   : > { %p1486_p8 = pnand %p1495_p0, %p83_p2  ;;  %s304_s9 = scalar_lea.sflag [#allocation7], %s303_s27 }
  0x48   : > { %s1909_s11 = smov 64   ;;  %s1910_s23 = smov 4  }
  0x49   : > { %1488 = dma.hbm_to_vmem [thread:$0]  (!%p1486_p8), %s314_s0, 1024, %s316_s26, %s304_s9, %s1909_s11, %s1909_s11, %s1910_s23  }
  0x4a   : > { %327 = sbr.rel (%p2058_p13) target bundleno = 796 (0x31c), region = 48  ;;  %s329_s17 = sand.u32 (!%p2058_p13), 1, %s1878_s8  }
  0x4b   : > { %s1350_s22 = sshll.u32 (!%p2058_p13), %s329_s17, 8  ;;  %s330_s5 = scalar_lea.sflag (!%p2058_p13), [#allocation4], %s329_s17 }
  0x4c   : > { %s2142_s24 = scalar_lea.vmem (!%p2058_p13), [#allocation3], %s1350_s22 }
  0x4f   : > { %1829 = dma.done.wait (%p2030_p3), %s330_s5, 4096  }
  0x50   : > { %1831 = vsyncadd (%p2030_p3), %s330_s5, 4294963200  ;;  %s339_s20 = sand.u32 1, %s2021_s15   ;;  %s341_s0 = sand.u32 1, %s1866_s28  }
  0x51   : > { %s1351_s26 = sshll.u32 %s341_s0, 6  ;;  %s340_s30 = scalar_lea.sflag [#allocation7], %s339_s20 }
  0x52   : > { %s2150_s27 = scalar_lea.vmem [#allocation6], %s1351_s26 }
  0x53   : > { %1833 = dma.done.wait (%p2038_p5), %s340_s30, 1024  }
  0x54   : > { %1835 = vsyncadd (%p2038_p5), %s340_s30, 4294966272 }
  0x55   : > { %1837 = dma.done.wait (%p62_p1), [#allocation7], 2048  }
  0x56   : > { %1839 = vsyncadd (%p62_p1), [#allocation7], 4294965248 }
  0x57   : > { %1841 = dma.done.wait (%p62_p1), [#allocation10], 2048  }
  0x58   : > { %1843 = vsyncadd (%p62_p1), [#allocation10], 4294965248  ;;  %s387_s18 = sand.u32 1, %s1854_s25   ;;  %p1355_p3 = scmp.ne.s32.totalorder %s1886_s10, 0 }
  0x59   : > { %s1354_s4 = sshll.u32 %s387_s18, 8 }
  0x5a   : > { %s2167_s2 = scalar_lea.vmem [#allocation11], %s1354_s4  ;;  %396 = sbr.rel (%p1355_p3) target bundleno = 128 (0x80), region = 68 }
  0x5f   : > { %v1911_v0 = vmov 0.0  }
  0x60   : > { %397 = vst [vmem:[#allocation2 + $0xb0] sm:$0xff] %v1911_v0 }
  0x61   : > { %398 = vst [vmem:[#allocation2] sm:$0xff] %v1911_v0 }
  0x62   : > { %399 = vst [vmem:[#allocation2 + $0xd8] sm:$0xff] %v1911_v0 }
  0x63   : > { %400 = vst [vmem:[#allocation2 + $0x18] sm:$0xff] %v1911_v0 }
  0x64   : > { %401 = vst [vmem:[#allocation2 + $0x50] sm:$0xff] %v1911_v0 }
  0x65   : > { %402 = vst [vmem:[#allocation2 + $0x68] sm:$0xff] %v1911_v0 }
  0x66   : > { %403 = vst [vmem:[#allocation2 + $0x30] sm:$0xff] %v1911_v0 }
  0x67   : > { %404 = vst [vmem:[#allocation2 + $0x48] sm:$0xff] %v1911_v0 }
  0x68   : > { %405 = vst [vmem:[#allocation2 + $0x80] sm:$0xff] %v1911_v0 }
  0x69   : > { %406 = vst [vmem:[#allocation2 + $0x88] sm:$0xff] %v1911_v0 }
  0x6a   : > { %407 = vst [vmem:[#allocation2 + $0xe8] sm:$0xff] %v1911_v0 }
  0x6b   : > { %408 = vst [vmem:[#allocation2 + $0xb8] sm:$0xff] %v1911_v0 }
  0x6c   : > { %409 = vst [vmem:[#allocation2 + $0x60] sm:$0xff] %v1911_v0 }
  0x6d   : > { %410 = vst [vmem:[#allocation2 + $0xf0] sm:$0xff] %v1911_v0 }
  0x6e   : > { %411 = vst [vmem:[#allocation2 + $0x8] sm:$0xff] %v1911_v0 }
  0x6f   : > { %412 = vst [vmem:[#allocation2 + $0x78] sm:$0xff] %v1911_v0 }
  0x70   : > { %413 = vst [vmem:[#allocation2 + $0x38] sm:$0xff] %v1911_v0 }
  0x71   : > { %414 = vst [vmem:[#allocation2 + $0x58] sm:$0xff] %v1911_v0 }
  0x72   : > { %415 = vst [vmem:[#allocation2 + $0x40] sm:$0xff] %v1911_v0 }
  0x73   : > { %416 = vst [vmem:[#allocation2 + $0xc8] sm:$0xff] %v1911_v0 }
  0x74   : > { %417 = vst [vmem:[#allocation2 + $0xe0] sm:$0xff] %v1911_v0 }
  0x75   : > { %418 = vst [vmem:[#allocation2 + $0x90] sm:$0xff] %v1911_v0 }
  0x76   : > { %419 = vst [vmem:[#allocation2 + $0x70] sm:$0xff] %v1911_v0 }
  0x77   : > { %420 = vst [vmem:[#allocation2 + $0xc0] sm:$0xff] %v1911_v0 }
  0x78   : > { %421 = vst [vmem:[#allocation2 + $0xa8] sm:$0xff] %v1911_v0 }
  0x79   : > { %422 = vst [vmem:[#allocation2 + $0xd0] sm:$0xff] %v1911_v0 }
  0x7a   : > { %423 = vst [vmem:[#allocation2 + $0x10] sm:$0xff] %v1911_v0 }
  0x7b   : > { %424 = vst [vmem:[#allocation2 + $0x28] sm:$0xff] %v1911_v0 }
  0x7c   : > { %425 = vst [vmem:[#allocation2 + $0xa0] sm:$0xff] %v1911_v0 }
  0x7d   : > { %426 = vst [vmem:[#allocation2 + $0xf8] sm:$0xff] %v1911_v0 }
  0x7e   : > { %427 = vst [vmem:[#allocation2 + $0x20] sm:$0xff] %v1911_v0 }
  0x7f   : > { %428 = vst [vmem:[#allocation2 + $0x98] sm:$0xff] %v1911_v0 }
  0x80 PF: > { %v1402_v1 = vld [vmem:[%s2150_s27 + $0x38] sm:$0xff]  ;;  %v1401_v2 = vld [vmem:[%s2150_s27 + $0x30] sm:$0xff]  ;;  %v1400_v3 = vld [vmem:[%s2150_s27 + $0x28] sm:$0xff]  ;;  %p1388_p1 = scmp.ne.s32.totalorder %s1886_s10, 2 }
  0x81   : > { %573 = vmatpush.bf16.msra.mxu0 %v1402_v1  ;;  %1404 = vmatpush.bf16.msra.mxu1 %v1402_v1  ;;  %v1399_v4 = vld [vmem:[%s2150_s27 + $0x20] sm:$0xff]  ;;  %v1398_v5 = vld [vmem:[%s2150_s27 + $0x18] sm:$0xff]  ;;  %v1397_v6 = vld [vmem:[%s2150_s27 + $0x10] sm:$0xff]  ;;  %s2473_s19 = sld [smem:[#allocation29_spill]] (!%p1388_p1) }
  0x82   : > { %1405 = vmatpush.bf16.msra.mxu2 %v1402_v1  ;;  %1406 = vmatpush.bf16.msra.mxu3 %v1402_v1  ;;  %v1396_v7 = vld [vmem:[%s2150_s27 + $0x8] sm:$0xff]  ;;  %v1395_v8 = vld [vmem:[%s2150_s27] sm:$0xff]  ;;  %v463_v21 = vld [vmem:[%s2142_s24 + $0x10] sm:$0xff]  ;;  %s2474_s16 = sld [smem:[#allocation31_spill]] (!%p1388_p1) }
  0x83   : > { %v461_v9 = vld [vmem:[%s2142_s24] sm:$0xff]  ;;  %v462_v10 = vld [vmem:[%s2142_s24 + $0x8] sm:$0xff]  ;;  %v464_v22 = vld [vmem:[%s2142_s24 + $0x18] sm:$0xff]  ;;  %s2475_s9 = sld [smem:[#allocation33_spill]] (!%p1388_p1) }
  0x84   : > { %v469_v11 = vld [vmem:[%s2142_s24 + $0x40] sm:$0xff]  ;;  %v470_v12 = vld [vmem:[%s2142_s24 + $0x48] sm:$0xff]  ;;  %v493_v17 = vpack.c.bf16 %v462_v10, %v461_v9  ;;  %v471_v23 = vld [vmem:[%s2142_s24 + $0x50] sm:$0xff]  ;;  %v494_v29 = vpack.c.bf16 %v464_v22, %v463_v21 }
  0x85   : > { %574 = vmatpush.bf16.msra.mxu0 %v1401_v2  ;;  %1407 = vmatpush.bf16.msra.mxu1 %v1401_v2  ;;  %v477_v13 = vld [vmem:[%s2142_s24 + $0x80] sm:$0xff]  ;;  %v478_v14 = vld [vmem:[%s2142_s24 + $0x88] sm:$0xff]  ;;  %v497_v18 = vpack.c.bf16 %v470_v12, %v469_v11  ;;  %v472_v24 = vld [vmem:[%s2142_s24 + $0x58] sm:$0xff] }
  0x86   : > { %1408 = vmatpush.bf16.msra.mxu2 %v1401_v2  ;;  %1409 = vmatpush.bf16.msra.mxu3 %v1401_v2  ;;  %v485_v15 = vld [vmem:[%s2142_s24 + $0xc0] sm:$0xff]  ;;  %v486_v16 = vld [vmem:[%s2142_s24 + $0xc8] sm:$0xff]  ;;  %v501_v19 = vpack.c.bf16 %v478_v14, %v477_v13  ;;  %v479_v25 = vld [vmem:[%s2142_s24 + $0x90] sm:$0xff]  ;;  %v498_v30 = vpack.c.bf16 %v472_v24, %v471_v23 }
  0x87   : > { %v505_v20 = vpack.c.bf16 %v486_v16, %v485_v15  ;;  %v480_v26 = vld [vmem:[%s2142_s24 + $0x98] sm:$0xff]  ;;  %v487_v27 = vld [vmem:[%s2142_s24 + $0xd0] sm:$0xff]  ;;  %v465_v33 = vld [vmem:[%s2142_s24 + $0x20] sm:$0xff] }
  0x88   : > { %v488_v28 = vld [vmem:[%s2142_s24 + $0xd8] sm:$0xff]  ;;  %v502_v31 = vpack.c.bf16 %v480_v26, %v479_v25  ;;  %v466_v34 = vld [vmem:[%s2142_s24 + $0x28] sm:$0xff]  ;;  %v473_v35 = vld [vmem:[%s2142_s24 + $0x60] sm:$0xff] }
  0x89   : > { %575 = vmatpush.bf16.msra.mxu0 %v1400_v3  ;;  %1410 = vmatpush.bf16.msra.mxu1 %v1400_v3  ;;  %v506_v32 = vpack.c.bf16 %v488_v28, %v487_v27  ;;  %v474_v36 = vld [vmem:[%s2142_s24 + $0x68] sm:$0xff]  ;;  %v481_v37 = vld [vmem:[%s2142_s24 + $0xa0] sm:$0xff]  ;;  %v495_v41 = vpack.c.bf16 %v466_v34, %v465_v33  ;;  %v467_v45 = vld [vmem:[%s2142_s24 + $0x30] sm:$0xff] }
  0x8a   : > { %1411 = vmatpush.bf16.msra.mxu2 %v1400_v3  ;;  %1412 = vmatpush.bf16.msra.mxu3 %v1400_v3  ;;  %v482_v38 = vld [vmem:[%s2142_s24 + $0xa8] sm:$0xff]  ;;  %v489_v39 = vld [vmem:[%s2142_s24 + $0xe0] sm:$0xff]  ;;  %v499_v42 = vpack.c.bf16 %v474_v36, %v473_v35  ;;  %v468_v46 = vld [vmem:[%s2142_s24 + $0x38] sm:$0xff] }
  0x8b   : > { %v490_v40 = vld [vmem:[%s2142_s24 + $0xe8] sm:$0xff]  ;;  %v503_v43 = vpack.c.bf16 %v482_v38, %v481_v37  ;;  %v475_v47 = vld [vmem:[%s2142_s24 + $0x70] sm:$0xff]  ;;  %v476_v48 = vld [vmem:[%s2142_s24 + $0x78] sm:$0xff]  ;;  %v496_v53 = vpack.c.bf16 %v468_v46, %v467_v45 }
  0x8c   : > { %v507_v44 = vpack.c.bf16 %v490_v40, %v489_v39  ;;  %v483_v49 = vld [vmem:[%s2142_s24 + $0xb0] sm:$0xff]  ;;  %v484_v50 = vld [vmem:[%s2142_s24 + $0xb8] sm:$0xff]  ;;  %v500_v54 = vpack.c.bf16 %v476_v48, %v475_v47  ;;  %v437_v58 = vld [vmem:[#allocation2 + $0x80] sm:$0xff] }
  0x8d   : > { %576 = vmatpush.bf16.msra.mxu0 %v1399_v4  ;;  %1413 = vmatpush.bf16.msra.mxu1 %v1399_v4  ;;  %v491_v51 = vld [vmem:[%s2142_s24 + $0xf0] sm:$0xff]  ;;  %v492_v52 = vld [vmem:[%s2142_s24 + $0xf8] sm:$0xff]  ;;  %v504_v55 = vpack.c.bf16 %v484_v50, %v483_v49  ;;  %v453_v0 = vld [vmem:[#allocation2 + $0xa8] sm:$0xff] }
  0x8e   : > { %1414 = vmatpush.bf16.msra.mxu2 %v1399_v4  ;;  %1415 = vmatpush.bf16.msra.mxu3 %v1399_v4  ;;  %v508_v56 = vpack.c.bf16 %v492_v52, %v491_v51  ;;  %v429_v57 = vld [vmem:[#allocation2 + $0xb0] sm:$0xff]  ;;  %v445_v63 = vld [vmem:[#allocation2 + $0x38] sm:$0xff]  ;;  %v430_v1 = vld [vmem:[#allocation2] sm:$0xff] }
  0x8f   : > { %v438_v2 = vld [vmem:[#allocation2 + $0x88] sm:$0xff]  ;;  %v446_v11 = vld [vmem:[#allocation2 + $0x58] sm:$0xff]  ;;  %v454_v12 = vld [vmem:[#allocation2 + $0xd0] sm:$0xff] }
  0x90   : > { %v431_v13 = vld [vmem:[#allocation2 + $0xd8] sm:$0xff]  ;;  %v439_v14 = vld [vmem:[#allocation2 + $0xe8] sm:$0xff]  ;;  %v447_v23 = vld [vmem:[#allocation2 + $0x40] sm:$0xff] }
  0x91   : > { %577 = vmatpush.bf16.msra.mxu0 %v1398_v5  ;;  %1416 = vmatpush.bf16.msra.mxu1 %v1398_v5  ;;  %v455_v24 = vld [vmem:[#allocation2 + $0x10] sm:$0xff]  ;;  %v432_v25 = vld [vmem:[#allocation2 + $0x18] sm:$0xff]  ;;  %v448_v35 = vld [vmem:[#allocation2 + $0xc8] sm:$0xff] }
  0x92   : > { %1417 = vmatpush.bf16.msra.mxu2 %v1398_v5  ;;  %1418 = vmatpush.bf16.msra.mxu3 %v1398_v5  ;;  %v440_v26 = vld [vmem:[#allocation2 + $0xb8] sm:$0xff]  ;;  %v456_v36 = vld [vmem:[#allocation2 + $0x28] sm:$0xff]  ;;  %v433_v37 = vld [vmem:[#allocation2 + $0x50] sm:$0xff] }
  0x93   : > { %v441_v38 = vld [vmem:[#allocation2 + $0x60] sm:$0xff]  ;;  %v434_v49 = vld [vmem:[#allocation2 + $0x68] sm:$0xff]  ;;  %v442_v50 = vld [vmem:[#allocation2 + $0xf0] sm:$0xff] }
  0x94   : > { %v449_v47 = vld [vmem:[#allocation2 + $0xe0] sm:$0xff] }
  0x95   : > { %578 = vmatpush.bf16.msra.mxu0 %v1397_v6  ;;  %1419 = vmatpush.bf16.msra.mxu1 %v1397_v6  ;;  %v457_v48 = vld [vmem:[#allocation2 + $0xa0] sm:$0xff] }
  0x96   : > { %1420 = vmatpush.bf16.msra.mxu2 %v1397_v6  ;;  %1421 = vmatpush.bf16.msra.mxu3 %v1397_v6 }
  0x99   : > { %579 = vmatpush.bf16.msra.mxu0 %v1396_v7  ;;  %1422 = vmatpush.bf16.msra.mxu1 %v1396_v7 }
  0x9a   : > { %1423 = vmatpush.bf16.msra.mxu2 %v1396_v7  ;;  %1424 = vmatpush.bf16.msra.mxu3 %v1396_v7 }
  0x9d   : > { %580 = vmatpush.bf16.msra.mxu0 %v1395_v8  ;;  %1425 = vmatpush.bf16.msra.mxu1 %v1395_v8 }
  0x9e   : > { %1426 = vmatpush.bf16.msra.mxu2 %v1395_v8  ;;  %1427 = vmatpush.bf16.msra.mxu3 %v1395_v8 }
  0xa0   : > { %581 = vmatmul.bf16.vlgmr.msra.gmra.mxu0 %v493_v17  ;;  %601 = vmatmul.bf16.vlgmr.msra.gmra.mxu1 %v497_v18 }
  0xa1   : > { %621 = vmatmul.bf16.vlgmr.msra.gmra.mxu2 %v501_v19  ;;  %641 = vmatmul.bf16.vlgmr.msra.gmra.mxu3 %v505_v20 }
  0xb0   : > { %586 = vmatmul.bf16.gmra.mxu0 %v494_v29  ;;  %606 = vmatmul.bf16.gmra.mxu1 %v498_v30 }
  0xb1   : > { %626 = vmatmul.bf16.gmra.mxu2 %v502_v31  ;;  %646 = vmatmul.bf16.gmra.mxu3 %v506_v32 }
  0xc0   : > { %591 = vmatmul.bf16.gmra.mxu0 %v495_v41  ;;  %611 = vmatmul.bf16.gmra.mxu1 %v499_v42 }
  0xc1   : > { %631 = vmatmul.bf16.gmra.mxu2 %v503_v43  ;;  %651 = vmatmul.bf16.gmra.mxu3 %v507_v44 }
  0xd0   : > { %596 = vmatmul.bf16.gmra.mxu0 %v496_v53  ;;  %616 = vmatmul.bf16.gmra.mxu1 %v500_v54 }
  0xd1   : > { %636 = vmatmul.bf16.gmra.mxu2 %v504_v55  ;;  %656 = vmatmul.bf16.gmra.mxu3 %v508_v56 }
 0x11d   : > { %v582_v59 = vpop.f32.mrf.mxu0  ;;  %v602_v60 = vpop.f32.mrf.mxu1 }
 0x11e   : > { %v662_v61 = vadd.f32 %v582_v59, %v429_v57  ;;  %v670_v62 = vadd.f32 %v602_v60, %v437_v58  ;;  %v450_v59 = vld [vmem:[#allocation2 + $0x90] sm:$0xff]  ;;  %v458_v60 = vld [vmem:[#allocation2 + $0xf8] sm:$0xff] }
 0x120   : > { %694 = vst [vmem:[#allocation2 + $0xb0] sm:$0xff] %v662_v61  ;;  %v435_v61 = vld [vmem:[#allocation2 + $0x30] sm:$0xff] }
 0x121   : > { %702 = vst [vmem:[#allocation2 + $0x80] sm:$0xff] %v670_v62  ;;  %v443_v62 = vld [vmem:[#allocation2 + $0x8] sm:$0xff] }
 0x124   : > { %v622_v3 = vpop.f32.mrf.mxu2  ;;  %v642_v4 = vpop.f32.mrf.mxu3 }
 0x125   : > { %v678_v5 = vadd.f32 %v622_v3, %v445_v63  ;;  %v686_v6 = vadd.f32 %v642_v4, %v453_v0  ;;  %v584_v7 = vpop.f32.mrf.mxu0  ;;  %v604_v8 = vpop.f32.mrf.mxu1 }
 0x126   : > { %v663_v9 = vadd.f32 %v584_v7, %v430_v1  ;;  %v671_v10 = vadd.f32 %v604_v8, %v438_v2  ;;  %v451_v7 = vld [vmem:[#allocation2 + $0x70] sm:$0xff]  ;;  %v459_v8 = vld [vmem:[#allocation2 + $0x20] sm:$0xff] }
 0x127   : > { %710 = vst [vmem:[#allocation2 + $0x38] sm:$0xff] %v678_v5 }
 0x128   : > { %718 = vst [vmem:[#allocation2 + $0xa8] sm:$0xff] %v686_v6 }
 0x129   : > { %695 = vst [vmem:[#allocation2] sm:$0xff] %v663_v9  ;;  %v436_v9 = vld [vmem:[#allocation2 + $0x48] sm:$0xff] }
 0x12a   : > { %703 = vst [vmem:[#allocation2 + $0x88] sm:$0xff] %v671_v10  ;;  %v444_v10 = vld [vmem:[#allocation2 + $0x78] sm:$0xff] }
 0x12c   : > { %v624_v15 = vpop.f32.mrf.mxu2  ;;  %v644_v16 = vpop.f32.mrf.mxu3 }
 0x12d   : > { %v679_v17 = vadd.f32 %v624_v15, %v446_v11  ;;  %v687_v18 = vadd.f32 %v644_v16, %v454_v12  ;;  %v587_v19 = vpop.f32.mrf.mxu0  ;;  %v607_v20 = vpop.f32.mrf.mxu1 }
 0x12e   : > { %v664_v21 = vadd.f32 %v587_v19, %v431_v13  ;;  %v672_v22 = vadd.f32 %v607_v20, %v439_v14  ;;  %v452_v19 = vld [vmem:[#allocation2 + $0xc0] sm:$0xff]  ;;  %v460_v20 = vld [vmem:[#allocation2 + $0x98] sm:$0xff] }
 0x12f   : > { %711 = vst [vmem:[#allocation2 + $0x58] sm:$0xff] %v679_v17 }
 0x130   : > { %719 = vst [vmem:[#allocation2 + $0xd0] sm:$0xff] %v687_v18 }
 0x131   : > { %696 = vst [vmem:[#allocation2 + $0xd8] sm:$0xff] %v664_v21 }
 0x132   : > { %704 = vst [vmem:[#allocation2 + $0xe8] sm:$0xff] %v672_v22 }
 0x134   : > { %v627_v27 = vpop.f32.mrf.mxu2  ;;  %v647_v28 = vpop.f32.mrf.mxu3 }
 0x135   : > { %v680_v29 = vadd.f32 %v627_v27, %v447_v23  ;;  %v688_v30 = vadd.f32 %v647_v28, %v455_v24  ;;  %v589_v31 = vpop.f32.mrf.mxu0  ;;  %v609_v32 = vpop.f32.mrf.mxu1 }
 0x136   : > { %v665_v33 = vadd.f32 %v589_v31, %v432_v25  ;;  %v673_v34 = vadd.f32 %v609_v32, %v440_v26 }
 0x137   : > { %712 = vst [vmem:[#allocation2 + $0x40] sm:$0xff] %v680_v29 }
 0x138   : > { %720 = vst [vmem:[#allocation2 + $0x10] sm:$0xff] %v688_v30 }
 0x139   : > { %697 = vst [vmem:[#allocation2 + $0x18] sm:$0xff] %v665_v33 }
 0x13a   : > { %705 = vst [vmem:[#allocation2 + $0xb8] sm:$0xff] %v673_v34 }
 0x13c   : > { %v629_v39 = vpop.f32.mrf.mxu2  ;;  %v649_v40 = vpop.f32.mrf.mxu3 }
 0x13d   : > { %v681_v41 = vadd.f32 %v629_v39, %v448_v35  ;;  %v689_v42 = vadd.f32 %v649_v40, %v456_v36  ;;  %v592_v43 = vpop.f32.mrf.mxu0  ;;  %v612_v44 = vpop.f32.mrf.mxu1 }
 0x13e   : > { %v666_v45 = vadd.f32 %v592_v43, %v433_v37  ;;  %v674_v46 = vadd.f32 %v612_v44, %v441_v38 }
 0x13f   : > { %713 = vst [vmem:[#allocation2 + $0xc8] sm:$0xff] %v681_v41 }
 0x140   : > { %721 = vst [vmem:[#allocation2 + $0x28] sm:$0xff] %v689_v42 }
 0x141   : > { %698 = vst [vmem:[#allocation2 + $0x50] sm:$0xff] %v666_v45 }
 0x142   : > { %706 = vst [vmem:[#allocation2 + $0x60] sm:$0xff] %v674_v46 }
 0x144   : > { %v632_v51 = vpop.f32.mrf.mxu2  ;;  %v652_v52 = vpop.f32.mrf.mxu3 }
 0x145   : > { %v682_v53 = vadd.f32 %v632_v51, %v449_v47  ;;  %v690_v54 = vadd.f32 %v652_v52, %v457_v48  ;;  %v594_v55 = vpop.f32.mrf.mxu0  ;;  %v614_v56 = vpop.f32.mrf.mxu1 }
 0x146   : > { %v667_v57 = vadd.f32 %v594_v55, %v434_v49  ;;  %v675_v58 = vadd.f32 %v614_v56, %v442_v50 }
 0x147   : > { %714 = vst [vmem:[#allocation2 + $0xe0] sm:$0xff] %v682_v53 }
 0x148   : > { %722 = vst [vmem:[#allocation2 + $0xa0] sm:$0xff] %v690_v54 }
 0x149   : > { %699 = vst [vmem:[#allocation2 + $0x68] sm:$0xff] %v667_v57 }
 0x14a   : > { %707 = vst [vmem:[#allocation2 + $0xf0] sm:$0xff] %v675_v58 }
 0x14c   : > { %v634_v63 = vpop.f32.mrf.mxu2  ;;  %v654_v0 = vpop.f32.mrf.mxu3 }
 0x14d   : > { %v683_v1 = vadd.f32 %v634_v63, %v450_v59  ;;  %v691_v2 = vadd.f32 %v654_v0, %v458_v60  ;;  %v597_v3 = vpop.f32.mrf.mxu0  ;;  %v617_v4 = vpop.f32.mrf.mxu1 }
 0x14e   : > { %v668_v5 = vadd.f32 %v597_v3, %v435_v61  ;;  %v676_v6 = vadd.f32 %v617_v4, %v443_v62 }
 0x14f   : > { %715 = vst [vmem:[#allocation2 + $0x90] sm:$0xff] %v683_v1 }
 0x150   : > { %723 = vst [vmem:[#allocation2 + $0xf8] sm:$0xff] %v691_v2 }
 0x151   : > { %700 = vst [vmem:[#allocation2 + $0x30] sm:$0xff] %v668_v5 }
 0x152   : > { %708 = vst [vmem:[#allocation2 + $0x8] sm:$0xff] %v676_v6 }
 0x154   : > { %v637_v11 = vpop.f32.mrf.mxu2  ;;  %v657_v12 = vpop.f32.mrf.mxu3 }
 0x155   : > { %v684_v13 = vadd.f32 %v637_v11, %v451_v7  ;;  %v692_v14 = vadd.f32 %v657_v12, %v459_v8  ;;  %v599_v15 = vpop.f32.mrf.mxu0  ;;  %v619_v16 = vpop.f32.mrf.mxu1 }
 0x156   : > { %v669_v17 = vadd.f32 %v599_v15, %v436_v9  ;;  %v677_v18 = vadd.f32 %v619_v16, %v444_v10 }
 0x157   : > { %716 = vst [vmem:[#allocation2 + $0x70] sm:$0xff] %v684_v13 }
 0x158   : > { %724 = vst [vmem:[#allocation2 + $0x20] sm:$0xff] %v692_v14 }
 0x159   : > { %701 = vst [vmem:[#allocation2 + $0x48] sm:$0xff] %v669_v17 }
 0x15a   : > { %709 = vst [vmem:[#allocation2 + $0x78] sm:$0xff] %v677_v18 }
 0x15c   : > { %v639_v21 = vpop.f32.mrf.mxu2  ;;  %v659_v22 = vpop.f32.mrf.mxu3  ;;  %729 = sbr.rel (%p1388_p1) target bundleno = 774 (0x306), region = 72 }
 0x15d   : > { %v685_v23 = vadd.f32 %v639_v21, %v452_v19  ;;  %v693_v24 = vadd.f32 %v659_v22, %v460_v20 }
 0x15f   : > { %717 = vst [vmem:[#allocation2 + $0xc0] sm:$0xff] %v685_v23 }
 0x160   : > { %725 = vst [vmem:[#allocation2 + $0x98] sm:$0xff] %v693_v24 }
 0x161   : > { %v909_v25 = vld [vmem:[#allocation8 + $0x78] sm:$0xff]  ;;  %v908_v26 = vld [vmem:[#allocation8 + $0x70] sm:$0xff]  ;;  %v907_v27 = vld [vmem:[#allocation8 + $0x68] sm:$0xff] }
 0x162   : > { %1428 = vmatpush.msra.mxu2 %v909_v25  ;;  %914 = vmatpush.msra.mxu0 %v909_v25  ;;  %v906_v28 = vld [vmem:[#allocation8 + $0x60] sm:$0xff]  ;;  %v905_v29 = vld [vmem:[#allocation8 + $0x58] sm:$0xff]  ;;  %v904_v30 = vld [vmem:[#allocation8 + $0x50] sm:$0xff] }
 0x163   : > { %v903_v31 = vld [vmem:[#allocation8 + $0x48] sm:$0xff]  ;;  %v902_v32 = vld [vmem:[#allocation8 + $0x40] sm:$0xff]  ;;  %v901_v33 = vld [vmem:[#allocation8 + $0x38] sm:$0xff] }
 0x164   : > { %1429 = vmatpush.msra.mxu2 %v908_v26  ;;  %915 = vmatpush.msra.mxu0 %v908_v26  ;;  %v900_v34 = vld [vmem:[#allocation8 + $0x30] sm:$0xff]  ;;  %v2214_v35 = vld [vmem:[%s2473_s19] ss:$0 sm:$0xff]  ;;  %v899_v36 = vld [vmem:[#allocation8 + $0x28] sm:$0xff] }
 0x165   : > { %v746_v37 = vld [vmem:[#allocation2 + $0x38] sm:$0xff]  ;;  %v730_v38 = vld [vmem:[#allocation2 + $0xb0] sm:$0xff]  ;;  %v898_v39 = vld [vmem:[#allocation8 + $0x20] sm:$0xff] }
 0x166   : > { %1430 = vmatpush.msra.mxu2 %v907_v27  ;;  %916 = vmatpush.msra.mxu0 %v907_v27  ;;  %v782_v40 = vadd.f32 %v2214_v35, %v746_v37  ;;  %v766_v41 = vadd.f32 %v2214_v35, %v730_v38  ;;  %v897_v42 = vld [vmem:[#allocation8 + $0x18] sm:$0xff]  ;;  %v896_v43 = vld [vmem:[#allocation8 + $0x10] sm:$0xff]  ;;  %v895_v47 = vld [vmem:[#allocation8 + $0x8] sm:$0xff] }
 0x167   : > { %v747_v45 = vld [vmem:[#allocation2 + $0x58] sm:$0xff]  ;;  %v731_v48 = vld [vmem:[#allocation2] sm:$0xff]  ;;  %v749_v0 = vld [vmem:[#allocation2 + $0xc8] sm:$0xff] }
 0x168   : > { %1431 = vmatpush.msra.mxu2 %v906_v28  ;;  %917 = vmatpush.msra.mxu0 %v906_v28  ;;  %v846_v44 = vmul.f32 0.2, %v782_v40  ;;  %v830_v46 = vmul.f32 0.2, %v766_v41  ;;  %vm814_vm0 = vcmp.gt.f32.partialorder %v782_v40, 0.0  ;;  %vm798_vm1 = vcmp.gt.f32.partialorder %v766_v41, 0.0 }
 0x169   : > { %v894_v49 = vld [vmem:[#allocation8] sm:$0xff]  ;;  %v783_v50 = vadd.f32 %v2214_v35, %v747_v45  ;;  %v767_v53 = vadd.f32 %v2214_v35, %v731_v48  ;;  %v732_v57 = vld [vmem:[#allocation2 + $0xd8] sm:$0xff]  ;;  %v785_v3 = vadd.f32 %v2214_v35, %v749_v0  ;;  %v734_v9 = vld [vmem:[#allocation2 + $0x50] sm:$0xff] }
 0x16a   : > { %1432 = vmatpush.msra.mxu2 %v905_v29  ;;  %918 = vmatpush.msra.mxu0 %v905_v29  ;;  %v878_v51 = vsel %vm814_vm0, %v782_v40, %v846_v44  ;;  %v862_v52 = vsel %vm798_vm1, %v766_v41, %v830_v46  ;;  %v748_v56 = vld [vmem:[#allocation2 + $0x40] sm:$0xff]  ;;  %v768_v61 = vadd.f32 %v2214_v35, %v732_v57  ;;  %v733_v1 = vld [vmem:[#allocation2 + $0x18] sm:$0xff]  ;;  %v751_v16 = vld [vmem:[#allocation2 + $0x90] sm:$0xff] }
 0x16b   : > { %v847_v54 = vmul.f32 0.2, %v783_v50  ;;  %v831_v55 = vmul.f32 0.2, %v767_v53  ;;  %vm815_vm2 = vcmp.gt.f32.partialorder %v783_v50, 0.0  ;;  %vm799_vm3 = vcmp.gt.f32.partialorder %v767_v53, 0.0 }
 0x16c   : > { %1433 = vmatpush.msra.mxu2 %v904_v30  ;;  %919 = vmatpush.msra.mxu0 %v904_v30  ;;  %v784_v59 = vadd.f32 %v2214_v35, %v748_v56  ;;  %v832_v63 = vmul.f32 0.2, %v768_v61  ;;  %vm800_vm5 = vcmp.gt.f32.partialorder %v768_v61, 0.0  ;;  %v769_v5 = vadd.f32 %v2214_v35, %v733_v1  ;;  %v750_v8 = vld [vmem:[#allocation2 + $0xe0] sm:$0xff]  ;;  %v735_v17 = vld [vmem:[#allocation2 + $0x68] sm:$0xff]  ;;  %v752_v24 = vld [vmem:[#allocation2 + $0x70] sm:$0xff] }
 0x16d   : > { %v879_v58 = vsel %vm815_vm2, %v783_v50, %v847_v54  ;;  %v863_v60 = vsel %vm799_vm3, %v767_v53, %v831_v55  ;;  %v849_v6 = vmul.f32 0.2, %v785_v3  ;;  %vm817_vm6 = vcmp.gt.f32.partialorder %v785_v3, 0.0  ;;  %v736_v25 = vld [vmem:[#allocation2 + $0x30] sm:$0xff]  ;;  %v754_v41 = vld [vmem:[#allocation2 + $0xa8] sm:$0xff]  ;;  %v1042_v55 = vld [vmem:[#allocation9 + $0x78] sm:$0xff] }
 0x16e   : > { %1434 = vmatpush.msra.mxu2 %v903_v31  ;;  %920 = vmatpush.msra.mxu0 %v903_v31  ;;  %v848_v62 = vmul.f32 0.2, %v784_v59  ;;  %vm816_vm4 = vcmp.gt.f32.partialorder %v784_v59, 0.0  ;;  %v864_v4 = vsel %vm800_vm5, %v768_v61, %v832_v63  ;;  %v833_v7 = vmul.f32 0.2, %v769_v5  ;;  %v739_v50 = vld [vmem:[#allocation2 + $0x88] sm:$0xff] }
 0x16f   : > { %vm801_vm7 = vcmp.gt.f32.partialorder %v769_v5, 0.0  ;;  %v881_v10 = vsel %vm817_vm6, %v785_v3, %v849_v6  ;;  %v786_v11 = vadd.f32 %v2214_v35, %v750_v8  ;;  %v770_v13 = vadd.f32 %v2214_v35, %v734_v9  ;;  %1444 = vmatpush.msra.mxu3 %v1042_v55  ;;  %1047 = vmatpush.msra.mxu1 %v1042_v55  ;;  %v1041_v0 = vld [vmem:[#allocation9 + $0x70] sm:$0xff]  ;;  %v1040_v1 = vld [vmem:[#allocation9 + $0x68] sm:$0xff]  ;;  %v1039_v6 = vld [vmem:[#allocation9 + $0x60] sm:$0xff] }
 0x170   : > { %1435 = vmatpush.msra.mxu2 %v902_v32  ;;  %921 = vmatpush.msra.mxu0 %v902_v32  ;;  %v880_v2 = vsel %vm816_vm4, %v784_v59, %v848_v62  ;;  %v865_v12 = vsel %vm801_vm7, %v769_v5, %v833_v7  ;;  %v787_v19 = vadd.f32 %v2214_v35, %v751_v16  ;;  %v753_v32 = vld [vmem:[#allocation2 + $0xc0] sm:$0xff]  ;;  %v740_v59 = vld [vmem:[#allocation2 + $0xe8] sm:$0xff]  ;;  %v741_v5 = vld [vmem:[#allocation2 + $0xb8] sm:$0xff] }
 0x171   : > { %v850_v14 = vmul.f32 0.2, %v786_v11  ;;  %v834_v15 = vmul.f32 0.2, %v770_v13  ;;  %vm818_vm8 = vcmp.gt.f32.partialorder %v786_v11, 0.0  ;;  %vm802_vm9 = vcmp.gt.f32.partialorder %v770_v13, 0.0  ;;  %1445 = vmatpush.msra.mxu3 %v1041_v0  ;;  %1048 = vmatpush.msra.mxu1 %v1041_v0 }
 0x172   : > { %1436 = vmatpush.msra.mxu2 %v901_v33  ;;  %922 = vmatpush.msra.mxu0 %v901_v33  ;;  %v771_v21 = vadd.f32 %v2214_v35, %v735_v17  ;;  %v851_v22 = vmul.f32 0.2, %v787_v19  ;;  %vm819_vm10 = vcmp.gt.f32.partialorder %v787_v19, 0.0  ;;  %v788_v27 = vadd.f32 %v2214_v35, %v752_v24  ;;  %v737_v33 = vld [vmem:[#allocation2 + $0x48] sm:$0xff]  ;;  %v1038_v8 = vld [vmem:[#allocation9 + $0x58] sm:$0xff]  ;;  %v758_v16 = vld [vmem:[#allocation2 + $0xa0] sm:$0xff] }
 0x173   : > { %v882_v18 = vsel %vm818_vm8, %v786_v11, %v850_v14  ;;  %v866_v20 = vsel %vm802_vm9, %v770_v13, %v834_v15  ;;  %v772_v29 = vadd.f32 %v2214_v35, %v736_v25  ;;  %v773_v38 = vadd.f32 %v2214_v35, %v737_v33  ;;  %v757_v3 = vld [vmem:[#allocation2 + $0x28] sm:$0xff]  ;;  %1446 = vmatpush.msra.mxu3 %v1040_v1  ;;  %v1037_v13 = vld [vmem:[#allocation9 + $0x50] sm:$0xff]  ;;  %v742_v17 = vld [vmem:[#allocation2 + $0x60] sm:$0xff] }
 0x174   : > { %1437 = vmatpush.msra.mxu2 %v900_v34  ;;  %923 = vmatpush.msra.mxu0 %v900_v34  ;;  %v835_v23 = vmul.f32 0.2, %v771_v21  ;;  %vm803_vm11 = vcmp.gt.f32.partialorder %v771_v21, 0.0  ;;  %v883_v26 = vsel %vm819_vm10, %v787_v19, %v851_v22  ;;  %v852_v30 = vmul.f32 0.2, %v788_v27  ;;  %v1036_v14 = vld [vmem:[#allocation9 + $0x48] sm:$0xff] }
 0x175   : > { %v836_v31 = vmul.f32 0.2, %v772_v29  ;;  %vm820_vm12 = vcmp.gt.f32.partialorder %v788_v27, 0.0  ;;  %vm804_vm13 = vcmp.gt.f32.partialorder %v772_v29, 0.0  ;;  %v837_v40 = vmul.f32 0.2, %v773_v38  ;;  %1049 = vmatpush.msra.mxu1 %v1040_v1  ;;  %1447 = vmatpush.msra.mxu3 %v1039_v6 }
 0x176   : > { %1438 = vmatpush.msra.mxu2 %v899_v36  ;;  %924 = vmatpush.msra.mxu0 %v899_v36  ;;  %v867_v28 = vsel %vm803_vm11, %v771_v21, %v835_v23  ;;  %v884_v34 = vsel %vm820_vm12, %v788_v27, %v852_v30  ;;  %v789_v36 = vadd.f32 %v2214_v35, %v753_v32  ;;  %vm805_vm15 = vcmp.gt.f32.partialorder %v773_v38, 0.0  ;;  %v1033_v24 = vld [vmem:[#allocation9 + $0x30] sm:$0xff]  ;;  %v1032_v25 = vld [vmem:[#allocation9 + $0x28] sm:$0xff]  ;;  %v759_v27 = vld [vmem:[#allocation2 + $0xf8] sm:$0xff] }
 0x177   : > { %v868_v37 = vsel %vm804_vm13, %v772_v29, %v836_v31  ;;  %v790_v44 = vadd.f32 %v2214_v35, %v754_v41  ;;  %v869_v45 = vsel %vm805_vm15, %v773_v38, %v837_v40  ;;  %v775_v54 = vadd.f32 %v2214_v35, %v739_v50  ;;  %1050 = vmatpush.msra.mxu1 %v1039_v6  ;;  %v743_v29 = vld [vmem:[#allocation2 + $0xf0] sm:$0xff]  ;;  %v1031_v30 = vld [vmem:[#allocation9 + $0x20] sm:$0xff]  ;;  %v1030_v32 = vld [vmem:[#allocation9 + $0x18] sm:$0xff] }
 0x178   : > { %1439 = vmatpush.msra.mxu2 %v898_v39  ;;  %925 = vmatpush.msra.mxu0 %v898_v39  ;;  %v853_v39 = vmul.f32 0.2, %v789_v36  ;;  %vm821_vm14 = vcmp.gt.f32.partialorder %v789_v36, 0.0  ;;  %v776_v63 = vadd.f32 %v2214_v35, %v740_v59  ;;  %v793_v7 = vadd.f32 %v2214_v35, %v757_v3  ;;  %v760_v40 = vld [vmem:[#allocation2 + $0x20] sm:$0xff]  ;;  %v744_v41 = vld [vmem:[#allocation2 + $0x8] sm:$0xff]  ;;  %v761_v50 = vld [vmem:[#allocation2 + $0x98] sm:$0xff] }
 0x179   : > { %vm822_vm0 = vcmp.gt.f32.partialorder %v790_v44, 0.0  ;;  %v839_v57 = vmul.f32 0.2, %v775_v54  ;;  %vm807_vm3 = vcmp.gt.f32.partialorder %v775_v54, 0.0  ;;  %v777_v11 = vadd.f32 %v2214_v35, %v741_v5  ;;  %1448 = vmatpush.msra.mxu3 %v1038_v8  ;;  %1051 = vmatpush.msra.mxu1 %v1038_v8 }
 0x17a   : > { %1440 = vmatpush.msra.mxu2 %v897_v42  ;;  %926 = vmatpush.msra.mxu0 %v897_v42  ;;  %v738_v42 = vld [vmem:[#allocation2 + $0x80] sm:$0xff]  ;;  %vm808_vm5 = vcmp.gt.f32.partialorder %v776_v63, 0.0  ;;  %vm825_vm6 = vcmp.gt.f32.partialorder %v793_v7, 0.0  ;;  %v794_v21 = vadd.f32 %v2214_v35, %v758_v16  ;;  %v778_v23 = vadd.f32 %v2214_v35, %v742_v17 }
 0x17b   : > { %v774_v46 = vadd.f32 %v2214_v35, %v738_v42  ;;  %v871_v62 = vsel %vm807_vm3, %v775_v54, %v839_v57  ;;  %v841_v15 = vmul.f32 0.2, %v777_v11  ;;  %1449 = vmatpush.msra.mxu3 %v1037_v13  ;;  %1052 = vmatpush.msra.mxu1 %v1037_v13  ;;  %vm809_vm7 = vcmp.gt.f32.partialorder %v777_v11, 0.0  ;;  %v1028_v42 = vld [vmem:[#allocation9 + $0x8] sm:$0xff] }
 0x17c   : > { %1441 = vmatpush.msra.mxu2 %v896_v43  ;;  %927 = vmatpush.msra.mxu0 %v896_v43  ;;  %v885_v43 = vsel %vm821_vm14, %v789_v36, %v853_v39  ;;  %vm826_vm8 = vcmp.gt.f32.partialorder %v794_v21, 0.0  ;;  %vm810_vm9 = vcmp.gt.f32.partialorder %v778_v23, 0.0  ;;  %v795_v31 = vadd.f32 %v2214_v35, %v759_v27 }
 0x17d   : > { %v838_v48 = vmul.f32 0.2, %v774_v46  ;;  %vm806_vm1 = vcmp.gt.f32.partialorder %v774_v46, 0.0  ;;  %1450 = vmatpush.msra.mxu3 %v1036_v14  ;;  %1053 = vmatpush.msra.mxu1 %v1036_v14  ;;  %v873_v22 = vsel %vm809_vm7, %v777_v11, %v841_v15  ;;  %v779_v36 = vadd.f32 %v2214_v35, %v743_v29 }
 0x17e   : > { %1442 = vmatpush.msra.mxu2 %v895_v47  ;;  %928 = vmatpush.msra.mxu0 %v895_v47  ;;  %v854_v47 = vmul.f32 0.2, %v790_v44  ;;  %v859_v38 = vmul.f32 0.2, %v795_v31  ;;  %vm827_vm10 = vcmp.gt.f32.partialorder %v795_v31, 0.0 }
 0x17f   : > { %v870_v53 = vsel %vm806_vm1, %v774_v46, %v838_v48  ;;  %v843_v39 = vmul.f32 0.2, %v779_v36  ;;  %vm811_vm11 = vcmp.gt.f32.partialorder %v779_v36, 0.0 }
 0x180   : > { %1443 = vmatpush.msra.mxu2 %v894_v49  ;;  %929 = vmatpush.msra.mxu0 %v894_v49  ;;  %v755_v49 = vld [vmem:[#allocation2 + $0xd0] sm:$0xff] }
 0x181   : > { %978 = vmatmul.f32.vlgmr.msra.gmra.mxu2 %v878_v51  ;;  %930 = vmatmul.f32.vlgmr.msra.gmra.mxu0 %v862_v52  ;;  %v886_v51 = vsel %vm822_vm0, %v790_v44, %v854_v47  ;;  %v791_v52 = vadd.f32 %v2214_v35, %v755_v49  ;;  %v1027_v44 = vld [vmem:[#allocation9] sm:$0xff]  ;;  %v875_v46 = vsel %vm811_vm11, %v779_v36, %v843_v39 }
 0x182   : > { %v780_v47 = vadd.f32 %v2214_v35, %v744_v41 }
 0x183   : > { %v855_v56 = vmul.f32 0.2, %v791_v52  ;;  %vm823_vm2 = vcmp.gt.f32.partialorder %v791_v52, 0.0 }
 0x184   : > { %v844_v49 = vmul.f32 0.2, %v780_v47  ;;  %vm812_vm13 = vcmp.gt.f32.partialorder %v780_v47, 0.0 }
 0x186   : > { %v876_v54 = vsel %vm812_vm13, %v780_v47, %v844_v49 }
 0x189   : > { %981 = vmatmul.f32.gmra.mxu2 %v879_v58  ;;  %933 = vmatmul.f32.gmra.mxu0 %v863_v60  ;;  %v756_v58 = vld [vmem:[#allocation2 + $0x10] sm:$0xff]  ;;  %v887_v60 = vsel %vm823_vm2, %v791_v52, %v855_v56 }
 0x18a   : > { %v792_v61 = vadd.f32 %v2214_v35, %v756_v58 }
 0x18c   : > { %vm824_vm4 = vcmp.gt.f32.partialorder %v792_v61, 0.0 }
 0x191   : > { %984 = vmatmul.f32.gmra.mxu2 %v880_v2  ;;  %936 = vmatmul.f32.gmra.mxu0 %v864_v4  ;;  %v856_v2 = vmul.f32 0.2, %v792_v61  ;;  %v840_v4 = vmul.f32 0.2, %v776_v63 }
 0x193   : > { %v888_v9 = vsel %vm824_vm4, %v792_v61, %v856_v2 }
 0x199   : > { %987 = vmatmul.f32.gmra.mxu2 %v881_v10  ;;  %939 = vmatmul.f32.gmra.mxu0 %v865_v12  ;;  %v872_v10 = vsel %vm808_vm5, %v776_v63, %v840_v4  ;;  %v857_v12 = vmul.f32 0.2, %v793_v7 }
 0x19b   : > { %v889_v19 = vsel %vm825_vm6, %v793_v7, %v857_v12 }
 0x1a1   : > { %990 = vmatmul.f32.gmra.mxu2 %v882_v18  ;;  %942 = vmatmul.f32.gmra.mxu0 %v866_v20  ;;  %v1035_v18 = vld [vmem:[#allocation9 + $0x40] sm:$0xff]  ;;  %v1034_v20 = vld [vmem:[#allocation9 + $0x38] sm:$0xff] }
 0x1a2   : > { %1451 = vmatpush.msra.mxu3 %v1035_v18  ;;  %1054 = vmatpush.msra.mxu1 %v1035_v18 }
 0x1a4   : > { %1452 = vmatpush.msra.mxu3 %v1034_v20  ;;  %1055 = vmatpush.msra.mxu1 %v1034_v20 }
 0x1a6   : > { %1453 = vmatpush.msra.mxu3 %v1033_v24  ;;  %1056 = vmatpush.msra.mxu1 %v1033_v24 }
 0x1a8   : > { %1454 = vmatpush.msra.mxu3 %v1032_v25  ;;  %1057 = vmatpush.msra.mxu1 %v1032_v25 }
 0x1a9   : > { %993 = vmatmul.f32.gmra.mxu2 %v883_v26  ;;  %945 = vmatmul.f32.gmra.mxu0 %v867_v28  ;;  %v858_v26 = vmul.f32 0.2, %v794_v21  ;;  %v842_v28 = vmul.f32 0.2, %v778_v23 }
 0x1aa   : > { %1455 = vmatpush.msra.mxu3 %v1031_v30  ;;  %1058 = vmatpush.msra.mxu1 %v1031_v30 }
 0x1ab   : > { %v890_v33 = vsel %vm826_vm8, %v794_v21, %v858_v26 }
 0x1ac   : > { %1456 = vmatpush.msra.mxu3 %v1030_v32  ;;  %1059 = vmatpush.msra.mxu1 %v1030_v32 }
 0x1b1   : > { %996 = vmatmul.f32.gmra.mxu2 %v884_v34  ;;  %948 = vmatmul.f32.gmra.mxu0 %v868_v37  ;;  %v874_v34 = vsel %vm810_vm9, %v778_v23, %v842_v28  ;;  %v1029_v37 = vld [vmem:[#allocation9 + $0x10] sm:$0xff] }
 0x1b2   : > { %1457 = vmatpush.msra.mxu3 %v1029_v37  ;;  %1060 = vmatpush.msra.mxu1 %v1029_v37 }
 0x1b4   : > { %1458 = vmatpush.msra.mxu3 %v1028_v42  ;;  %1061 = vmatpush.msra.mxu1 %v1028_v42 }
 0x1b6   : > { %1459 = vmatpush.msra.mxu3 %v1027_v44  ;;  %1062 = vmatpush.msra.mxu1 %v1027_v44 }
 0x1b9   : > { %999 = vmatmul.f32.gmra.mxu2 %v885_v43  ;;  %951 = vmatmul.f32.gmra.mxu0 %v869_v45  ;;  %v891_v43 = vsel %vm827_vm10, %v795_v31, %v859_v38  ;;  %v796_v45 = vadd.f32 %v2214_v35, %v760_v40 }
 0x1bb   : > { %v860_v48 = vmul.f32 0.2, %v796_v45  ;;  %vm828_vm12 = vcmp.gt.f32.partialorder %v796_v45, 0.0 }
 0x1bd   : > { %v892_v52 = vsel %vm828_vm12, %v796_v45, %v860_v48 }
 0x1c1   : > { %1002 = vmatmul.f32.gmra.mxu2 %v886_v51  ;;  %954 = vmatmul.f32.gmra.mxu0 %v870_v53  ;;  %v745_v51 = vld [vmem:[#allocation2 + $0x78] sm:$0xff]  ;;  %v797_v53 = vadd.f32 %v2214_v35, %v761_v50 }
 0x1c2   : > { %v781_v55 = vadd.f32 %v2214_v35, %v745_v51 }
 0x1c3   : > { %v861_v56 = vmul.f32 0.2, %v797_v53  ;;  %vm829_vm14 = vcmp.gt.f32.partialorder %v797_v53, 0.0 }
 0x1c4   : > { %v845_v57 = vmul.f32 0.2, %v781_v55  ;;  %vm813_vm15 = vcmp.gt.f32.partialorder %v781_v55, 0.0 }
 0x1c5   : > { %v893_v58 = vsel %vm829_vm14, %v797_v53, %v861_v56 }
 0x1c6   : > { %v877_v59 = vsel %vm813_vm15, %v781_v55, %v845_v57 }
 0x1c9   : > { %1005 = vmatmul.f32.gmra.mxu2 %v887_v60  ;;  %957 = vmatmul.f32.gmra.mxu0 %v871_v62  ;;  %v2251_v60 = vld [vmem:[%s2474_s16] ss:$0 sm:$0xff] }
 0x1d1   : > { %1008 = vmatmul.f32.gmra.mxu2 %v888_v9  ;;  %960 = vmatmul.f32.gmra.mxu0 %v872_v10 }
 0x1d9   : > { %1011 = vmatmul.f32.gmra.mxu2 %v889_v19  ;;  %963 = vmatmul.f32.gmra.mxu0 %v873_v22 }
 0x1e1   : > { %1014 = vmatmul.f32.gmra.mxu2 %v890_v33  ;;  %966 = vmatmul.f32.gmra.mxu0 %v874_v34 }
 0x1e9   : > { %1017 = vmatmul.f32.gmra.mxu2 %v891_v43  ;;  %969 = vmatmul.f32.gmra.mxu0 %v875_v46 }
 0x1f1   : > { %1020 = vmatmul.f32.gmra.mxu2 %v892_v52  ;;  %972 = vmatmul.f32.gmra.mxu0 %v876_v54 }
 0x1f9   : > { %1023 = vmatmul.f32.gmra.mxu2 %v893_v58  ;;  %975 = vmatmul.f32.gmra.mxu0 %v877_v59  ;;  %v2287_v59 = vld [vmem:[%s2475_s9] ss:$0 sm:$0xff] }
 0x1fe   : > { %v931_v61 = vpop.f32.mrf.mxu0 }
 0x1ff   : > { %v932_v62 = vadd.f32 %v2251_v60, %v931_v61 }
 0x201   : > { %1063 = vmatmul.f32.vlgmr.msra.gmra.mxu1 %v932_v62 }
 0x204   : > { %v979_v35 = vpop.f32.mrf.mxu2 }
 0x205   : > { %v980_v63 = vadd.f32 %v2251_v60, %v979_v35 }
 0x206   : > { %v934_v0 = vpop.f32.mrf.mxu0 }
 0x207   : > { %1111 = vmatmul.f32.vlgmr.msra.gmra.mxu3 %v980_v63  ;;  %v935_v1 = vadd.f32 %v2251_v60, %v934_v0 }
 0x209   : > { %1066 = vmatmul.f32.gmra.mxu1 %v935_v1 }
 0x20c   : > { %v982_v2 = vpop.f32.mrf.mxu2 }
 0x20d   : > { %v983_v3 = vadd.f32 %v2251_v60, %v982_v2 }
 0x20e   : > { %v937_v4 = vpop.f32.mrf.mxu0 }
 0x20f   : > { %1114 = vmatmul.f32.gmra.mxu3 %v983_v3  ;;  %v938_v5 = vadd.f32 %v2251_v60, %v937_v4 }
 0x211   : > { %1069 = vmatmul.f32.gmra.mxu1 %v938_v5 }
 0x214   : > { %v985_v6 = vpop.f32.mrf.mxu2 }
 0x215   : > { %v986_v7 = vadd.f32 %v2251_v60, %v985_v6 }
 0x216   : > { %v940_v8 = vpop.f32.mrf.mxu0 }
 0x217   : > { %1117 = vmatmul.f32.gmra.mxu3 %v986_v7  ;;  %v941_v9 = vadd.f32 %v2251_v60, %v940_v8 }
 0x219   : > { %1072 = vmatmul.f32.gmra.mxu1 %v941_v9 }
 0x21c   : > { %v988_v10 = vpop.f32.mrf.mxu2 }
 0x21d   : > { %v989_v11 = vadd.f32 %v2251_v60, %v988_v10 }
 0x21e   : > { %v943_v12 = vpop.f32.mrf.mxu0 }
 0x21f   : > { %1120 = vmatmul.f32.gmra.mxu3 %v989_v11  ;;  %v944_v13 = vadd.f32 %v2251_v60, %v943_v12 }
 0x221   : > { %1075 = vmatmul.f32.gmra.mxu1 %v944_v13 }
 0x224   : > { %v991_v14 = vpop.f32.mrf.mxu2 }
 0x225   : > { %v992_v15 = vadd.f32 %v2251_v60, %v991_v14 }
 0x226   : > { %v946_v16 = vpop.f32.mrf.mxu0 }
 0x227   : > { %1123 = vmatmul.f32.gmra.mxu3 %v992_v15  ;;  %v947_v17 = vadd.f32 %v2251_v60, %v946_v16 }
 0x229   : > { %1078 = vmatmul.f32.gmra.mxu1 %v947_v17 }
 0x22c   : > { %v994_v18 = vpop.f32.mrf.mxu2 }
 0x22d   : > { %v995_v19 = vadd.f32 %v2251_v60, %v994_v18 }
 0x22e   : > { %v949_v20 = vpop.f32.mrf.mxu0 }
 0x22f   : > { %1126 = vmatmul.f32.gmra.mxu3 %v995_v19  ;;  %v950_v21 = vadd.f32 %v2251_v60, %v949_v20 }
 0x231   : > { %1081 = vmatmul.f32.gmra.mxu1 %v950_v21 }
 0x234   : > { %v997_v22 = vpop.f32.mrf.mxu2 }
 0x235   : > { %v998_v23 = vadd.f32 %v2251_v60, %v997_v22 }
 0x236   : > { %v952_v24 = vpop.f32.mrf.mxu0 }
 0x237   : > { %1129 = vmatmul.f32.gmra.mxu3 %v998_v23  ;;  %v953_v25 = vadd.f32 %v2251_v60, %v952_v24 }
 0x239   : > { %1084 = vmatmul.f32.gmra.mxu1 %v953_v25 }
 0x23c   : > { %v1000_v26 = vpop.f32.mrf.mxu2 }
 0x23d   : > { %v1001_v27 = vadd.f32 %v2251_v60, %v1000_v26 }
 0x23e   : > { %v955_v28 = vpop.f32.mrf.mxu0 }
 0x23f   : > { %1132 = vmatmul.f32.gmra.mxu3 %v1001_v27  ;;  %v956_v29 = vadd.f32 %v2251_v60, %v955_v28 }
 0x241   : > { %1087 = vmatmul.f32.gmra.mxu1 %v956_v29 }
 0x244   : > { %v1003_v30 = vpop.f32.mrf.mxu2 }
 0x245   : > { %v1004_v31 = vadd.f32 %v2251_v60, %v1003_v30 }
 0x246   : > { %v958_v32 = vpop.f32.mrf.mxu0 }
 0x247   : > { %1135 = vmatmul.f32.gmra.mxu3 %v1004_v31  ;;  %v959_v33 = vadd.f32 %v2251_v60, %v958_v32 }
 0x249   : > { %1090 = vmatmul.f32.gmra.mxu1 %v959_v33 }
 0x24c   : > { %v1006_v34 = vpop.f32.mrf.mxu2 }
 0x24d   : > { %v1007_v36 = vadd.f32 %v2251_v60, %v1006_v34 }
 0x24e   : > { %v961_v37 = vpop.f32.mrf.mxu0 }
 0x24f   : > { %1138 = vmatmul.f32.gmra.mxu3 %v1007_v36  ;;  %v962_v38 = vadd.f32 %v2251_v60, %v961_v37 }
 0x251   : > { %1093 = vmatmul.f32.gmra.mxu1 %v962_v38 }
 0x254   : > { %v1009_v39 = vpop.f32.mrf.mxu2 }
 0x255   : > { %v1010_v40 = vadd.f32 %v2251_v60, %v1009_v39 }
 0x256   : > { %v964_v41 = vpop.f32.mrf.mxu0 }
 0x257   : > { %1141 = vmatmul.f32.gmra.mxu3 %v1010_v40  ;;  %v965_v42 = vadd.f32 %v2251_v60, %v964_v41 }
 0x259   : > { %1096 = vmatmul.f32.gmra.mxu1 %v965_v42 }
 0x25c   : > { %v1012_v43 = vpop.f32.mrf.mxu2 }
 0x25d   : > { %v1013_v44 = vadd.f32 %v2251_v60, %v1012_v43 }
 0x25e   : > { %v967_v45 = vpop.f32.mrf.mxu0 }
 0x25f   : > { %1144 = vmatmul.f32.gmra.mxu3 %v1013_v44  ;;  %v968_v46 = vadd.f32 %v2251_v60, %v967_v45 }
 0x261   : > { %1099 = vmatmul.f32.gmra.mxu1 %v968_v46 }
 0x264   : > { %v1015_v47 = vpop.f32.mrf.mxu2 }
 0x265   : > { %v1016_v48 = vadd.f32 %v2251_v60, %v1015_v47 }
 0x266   : > { %v970_v49 = vpop.f32.mrf.mxu0 }
 0x267   : > { %1147 = vmatmul.f32.gmra.mxu3 %v1016_v48  ;;  %v971_v50 = vadd.f32 %v2251_v60, %v970_v49 }
 0x269   : > { %1102 = vmatmul.f32.gmra.mxu1 %v971_v50 }
 0x26c   : > { %v1018_v51 = vpop.f32.mrf.mxu2 }
 0x26d   : > { %v1019_v52 = vadd.f32 %v2251_v60, %v1018_v51 }
 0x26e   : > { %v973_v53 = vpop.f32.mrf.mxu0 }
 0x26f   : > { %1150 = vmatmul.f32.gmra.mxu3 %v1019_v52  ;;  %v974_v54 = vadd.f32 %v2251_v60, %v973_v53 }
 0x271   : > { %1105 = vmatmul.f32.gmra.mxu1 %v974_v54 }
 0x274   : > { %v1021_v55 = vpop.f32.mrf.mxu2 }
 0x275   : > { %v1022_v56 = vadd.f32 %v2251_v60, %v1021_v55 }
 0x276   : > { %v976_v57 = vpop.f32.mrf.mxu0 }
 0x277   : > { %1153 = vmatmul.f32.gmra.mxu3 %v1022_v56  ;;  %v977_v58 = vadd.f32 %v2251_v60, %v976_v57 }
 0x279   : > { %1108 = vmatmul.f32.gmra.mxu1 %v977_v58 }
 0x27c   : > { %v1024_v61 = vpop.f32.mrf.mxu2 }
 0x27d   : > { %v1025_v62 = vadd.f32 %v2251_v60, %v1024_v61 }
 0x27e   : > { %v1064_v35 = vpop.f32.mrf.mxu1 }
 0x27f   : > { %1156 = vmatmul.f32.gmra.mxu3 %v1025_v62  ;;  %v1065_v63 = vadd.f32 %v2287_v59, %v1064_v35 }
 0x281   : > { %1160 = vst [vmem:[%s2167_s2] sm:$0xff] %v1065_v63 }
 0x286   : > { %v1067_v0 = vpop.f32.mrf.mxu1 }
 0x287   : > { %v1068_v1 = vadd.f32 %v2287_v59, %v1067_v0 }
 0x289   : > { %1161 = vst [vmem:[%s2167_s2 + $0x8] sm:$0xff] %v1068_v1 }
 0x28a   : > { %v1112_v2 = vpop.f32.mrf.mxu3 }
 0x28b   : > { %v1113_v3 = vadd.f32 %v2287_v59, %v1112_v2 }
 0x28d   : > { %1176 = vst [vmem:[%s2167_s2 + $0x80] sm:$0xff] %v1113_v3 }
 0x28e   : > { %v1070_v4 = vpop.f32.mrf.mxu1 }
 0x28f   : > { %v1071_v60 = vadd.f32 %v2287_v59, %v1070_v4 }
 0x291   : > { %1162 = vst [vmem:[%s2167_s2 + $0x10] sm:$0xff] %v1071_v60 }
 0x292   : > { %v1115_v5 = vpop.f32.mrf.mxu3 }
 0x293   : > { %v1116_v6 = vadd.f32 %v2287_v59, %v1115_v5 }
 0x295   : > { %1177 = vst [vmem:[%s2167_s2 + $0x88] sm:$0xff] %v1116_v6 }
 0x296   : > { %v1073_v7 = vpop.f32.mrf.mxu1 }
 0x297   : > { %v1074_v8 = vadd.f32 %v2287_v59, %v1073_v7 }
 0x299   : > { %1163 = vst [vmem:[%s2167_s2 + $0x18] sm:$0xff] %v1074_v8 }
 0x29a   : > { %v1118_v9 = vpop.f32.mrf.mxu3 }
 0x29b   : > { %v1119_v10 = vadd.f32 %v2287_v59, %v1118_v9 }
 0x29d   : > { %1178 = vst [vmem:[%s2167_s2 + $0x90] sm:$0xff] %v1119_v10 }
 0x29e   : > { %v1076_v11 = vpop.f32.mrf.mxu1 }
 0x29f   : > { %v1077_v12 = vadd.f32 %v2287_v59, %v1076_v11 }
 0x2a1   : > { %1164 = vst [vmem:[%s2167_s2 + $0x20] sm:$0xff] %v1077_v12 }
 0x2a2   : > { %v1121_v13 = vpop.f32.mrf.mxu3 }
 0x2a3   : > { %v1122_v14 = vadd.f32 %v2287_v59, %v1121_v13 }
 0x2a5   : > { %1179 = vst [vmem:[%s2167_s2 + $0x98] sm:$0xff] %v1122_v14 }
 0x2a6   : > { %v1079_v15 = vpop.f32.mrf.mxu1 }
 0x2a7   : > { %v1080_v16 = vadd.f32 %v2287_v59, %v1079_v15 }
 0x2a9   : > { %1165 = vst [vmem:[%s2167_s2 + $0x28] sm:$0xff] %v1080_v16 }
 0x2aa   : > { %v1124_v17 = vpop.f32.mrf.mxu3 }
 0x2ab   : > { %v1125_v18 = vadd.f32 %v2287_v59, %v1124_v17 }
 0x2ad   : > { %1180 = vst [vmem:[%s2167_s2 + $0xa0] sm:$0xff] %v1125_v18 }
 0x2ae   : > { %v1082_v19 = vpop.f32.mrf.mxu1 }
 0x2af   : > { %v1083_v20 = vadd.f32 %v2287_v59, %v1082_v19 }
 0x2b1   : > { %1166 = vst [vmem:[%s2167_s2 + $0x30] sm:$0xff] %v1083_v20 }
 0x2b2   : > { %v1127_v21 = vpop.f32.mrf.mxu3 }
 0x2b3   : > { %v1128_v22 = vadd.f32 %v2287_v59, %v1127_v21 }
 0x2b5   : > { %1181 = vst [vmem:[%s2167_s2 + $0xa8] sm:$0xff] %v1128_v22 }
 0x2b6   : > { %v1085_v23 = vpop.f32.mrf.mxu1 }
 0x2b7   : > { %v1086_v24 = vadd.f32 %v2287_v59, %v1085_v23 }
 0x2b9   : > { %1167 = vst [vmem:[%s2167_s2 + $0x38] sm:$0xff] %v1086_v24 }
 0x2ba   : > { %v1130_v25 = vpop.f32.mrf.mxu3 }
 0x2bb   : > { %v1131_v26 = vadd.f32 %v2287_v59, %v1130_v25 }
 0x2bd   : > { %1182 = vst [vmem:[%s2167_s2 + $0xb0] sm:$0xff] %v1131_v26 }
 0x2be   : > { %v1088_v27 = vpop.f32.mrf.mxu1 }
 0x2bf   : > { %v1089_v28 = vadd.f32 %v2287_v59, %v1088_v27 }
 0x2c1   : > { %1168 = vst [vmem:[%s2167_s2 + $0x40] sm:$0xff] %v1089_v28 }
 0x2c2   : > { %v1133_v29 = vpop.f32.mrf.mxu3 }
 0x2c3   : > { %v1134_v30 = vadd.f32 %v2287_v59, %v1133_v29 }
 0x2c5   : > { %1183 = vst [vmem:[%s2167_s2 + $0xb8] sm:$0xff] %v1134_v30 }
 0x2c6   : > { %v1091_v31 = vpop.f32.mrf.mxu1 }
 0x2c7   : > { %v1092_v32 = vadd.f32 %v2287_v59, %v1091_v31 }
 0x2c9   : > { %1169 = vst [vmem:[%s2167_s2 + $0x48] sm:$0xff] %v1092_v32 }
 0x2ca   : > { %v1136_v33 = vpop.f32.mrf.mxu3 }
 0x2cb   : > { %v1137_v34 = vadd.f32 %v2287_v59, %v1136_v33 }
 0x2cd   : > { %1184 = vst [vmem:[%s2167_s2 + $0xc0] sm:$0xff] %v1137_v34 }
 0x2ce   : > { %v1094_v36 = vpop.f32.mrf.mxu1 }
 0x2cf   : > { %v1095_v37 = vadd.f32 %v2287_v59, %v1094_v36 }
 0x2d1   : > { %1170 = vst [vmem:[%s2167_s2 + $0x50] sm:$0xff] %v1095_v37 }
 0x2d2   : > { %v1139_v38 = vpop.f32.mrf.mxu3 }
 0x2d3   : > { %v1140_v39 = vadd.f32 %v2287_v59, %v1139_v38 }
 0x2d5   : > { %1185 = vst [vmem:[%s2167_s2 + $0xc8] sm:$0xff] %v1140_v39 }
 0x2d6   : > { %v1097_v40 = vpop.f32.mrf.mxu1 }
 0x2d7   : > { %v1098_v41 = vadd.f32 %v2287_v59, %v1097_v40 }
 0x2d9   : > { %1171 = vst [vmem:[%s2167_s2 + $0x58] sm:$0xff] %v1098_v41 }
 0x2da   : > { %v1142_v42 = vpop.f32.mrf.mxu3 }
 0x2db   : > { %v1143_v43 = vadd.f32 %v2287_v59, %v1142_v42 }
 0x2dd   : > { %1186 = vst [vmem:[%s2167_s2 + $0xd0] sm:$0xff] %v1143_v43 }
 0x2de   : > { %v1100_v44 = vpop.f32.mrf.mxu1 }
 0x2df   : > { %v1101_v45 = vadd.f32 %v2287_v59, %v1100_v44 }
 0x2e1   : > { %1172 = vst [vmem:[%s2167_s2 + $0x60] sm:$0xff] %v1101_v45 }
 0x2e2   : > { %v1145_v46 = vpop.f32.mrf.mxu3 }
 0x2e3   : > { %v1146_v47 = vadd.f32 %v2287_v59, %v1145_v46 }
 0x2e5   : > { %1187 = vst [vmem:[%s2167_s2 + $0xd8] sm:$0xff] %v1146_v47 }
 0x2e6   : > { %v1103_v48 = vpop.f32.mrf.mxu1 }
 0x2e7   : > { %v1104_v49 = vadd.f32 %v2287_v59, %v1103_v48 }
 0x2e9   : > { %1173 = vst [vmem:[%s2167_s2 + $0x68] sm:$0xff] %v1104_v49 }
 0x2ea   : > { %v1148_v50 = vpop.f32.mrf.mxu3 }
 0x2eb   : > { %v1149_v51 = vadd.f32 %v2287_v59, %v1148_v50 }
 0x2ed   : > { %1188 = vst [vmem:[%s2167_s2 + $0xe0] sm:$0xff] %v1149_v51 }
 0x2ee   : > { %v1106_v52 = vpop.f32.mrf.mxu1 }
 0x2ef   : > { %v1107_v53 = vadd.f32 %v2287_v59, %v1106_v52 }
 0x2f1   : > { %1174 = vst [vmem:[%s2167_s2 + $0x70] sm:$0xff] %v1107_v53 }
 0x2f2   : > { %v1151_v54 = vpop.f32.mrf.mxu3 }
 0x2f3   : > { %v1152_v55 = vadd.f32 %v2287_v59, %v1151_v54 }
 0x2f5   : > { %1189 = vst [vmem:[%s2167_s2 + $0xe8] sm:$0xff] %v1152_v55 }
 0x2f6   : > { %v1109_v56 = vpop.f32.mrf.mxu1 }
 0x2f7   : > { %v1110_v57 = vadd.f32 %v2287_v59, %v1109_v56 }
 0x2f9   : > { %1175 = vst [vmem:[%s2167_s2 + $0x78] sm:$0xff] %v1110_v57 }
 0x2fa   : > { %v1154_v58 = vpop.f32.mrf.mxu3 }
 0x2fb   : > { %v1155_v61 = vadd.f32 %v2287_v59, %v1154_v58 }
 0x2fd   : > { %1190 = vst [vmem:[%s2167_s2 + $0xf0] sm:$0xff] %v1155_v61 }
 0x302   : > { %v1157_v62 = vpop.f32.mrf.mxu3 }
 0x303   : > { %v1158_v35 = vadd.f32 %v2287_v59, %v1157_v62 }
 0x305   : > { %1191 = vst [vmem:[%s2167_s2 + $0xf8] sm:$0xff] %v1158_v35 }
 0x306 PF: > { %s2476_s11 = sld [smem:[#allocation20_spill]]  ;;  %s1205_s26 = sshll.u32 %s2167_s2, 4  ;;  %s1206_s26 = int_to_ptr.vmem [resolvable:$true] %s1205_s26 }
 0x307   : > { %s2478_s24 = sld [smem:[#allocation34_spill]]  ;;  %s1193_s27 = scalar_lea.sflag [#allocation5], %s387_s18 }
 0x30c   : > { %s1403_s17 = sshll.u32 %s2476_s11, 8 }
 0x30d   : > { %s2479_s20 = smov %s2478_s24  ;;  %s1204_s0 = scalar_lea.hbm %s2478_s24, %s1403_s17 }
 0x30e   : > { %s1207_s30 = sshll.u32 %s1204_s0, 4  ;;  %s1764_s3 = scalar_lea.hbm %s2479_s20, 512  ;;  %s1208_s30 = int_to_ptr.hbm [resolvable:$true] %s1207_s30 }
 0x30f   : > { %s1758_s4 = sshra.s32 %s1208_s30, 4  ;;  %s1759_s4 = int_to_ptr.hbm [resolvable:$true] %s1758_s4 }
 0x310   : > { %s1760_s10 = scalar_lea.hbm %s1759_s4, 256  ;;  %p1765_p12 = scmp.lt.s32.totalorder %s1759_s4, %s2479_s20 }
 0x311   : > { %p1761_p5 = scmp.ne.s32.totalorder %s1759_s4, %s1760_s10  ;;  %p1766_p0 = scmp.lt.s32.totalorder %s1764_s3, %s1760_s10 }
 0x313   : > { %p1762_p13 = pnand %p1761_p5, %p2045_p9  ;;  %p1767_p4 = por %p1766_p0, %p1765_p12 }
 0x315   : > { %p1763_p7 = pneg %p1762_p13 }
 0x317   : > { %p1768_p6 = pnand %p1767_p4, %p1763_p7 }
 0x319   : > { %1771 = shalt.err (!%p1768_p6)
}
 0x31a   : > { %s1912_s18 = smov 128   ;;  %s1913_s2 = smov 8  }
 0x31b   : > { %1473 = dma.vmem_to_hbm [thread:$0]  (%p2045_p9), %s1206_s26, 4096, %s1208_s30, %s1193_s27, %s1912_s18, %s1912_s18, %s1913_s2  }
 0x31c PF: > { %s2480_s13 = sld [smem:[#allocation17_spill]]  ;;  %p1498_p10 = scmp.ge.s32.totalorder %s1902_s14, 2 }
 0x31e   : > { %p1490_p2 = pnand %p1498_p10, %p2050_p11 }
 0x320   : > { %p1491_p8 = pneg %p1490_p2 }
 0x322   : > { %s1222_s9 = sand.u32 1, %s2480_s13  }
 0x323   : > { %s1223_s11 = scalar_lea.sflag [#allocation5], %s1222_s9 }
 0x324   : > { %1845 = dma.done.wait (%p1491_p8), %s1223_s11, 4096  }
 0x325   : > { %1847 = vsyncadd (%p1491_p8), %s1223_s11, 4294963200  ;;  %s27_s14 = sadd.s32 1, %s1902_s14   ;;  %s2483_s23 = sld [smem:[#allocation18_spill]] }
 0x326   : > { %p2376_p3 = scmp.ge.s32.totalorder %s27_s14, 8   ;;  %s2484_s26 = sld [smem:[#allocation26_spill]] }
 0x327   : > { %s2485_s22 = sld [smem:[#allocation19_spill]]  ;;  %s2490_s24 = smov %s1854_s25 }
 0x328   : > { %s2486_s9 = sld [smem:[#allocation27_spill]]  ;;  %s2492_s27 = smov %s1866_s28 }
 0x329   : > { %s2487_s11 = sld [smem:[#allocation21_spill]]  ;;  %s2493_s28 = smov %s1870_s29 }
 0x32a   : > { %s2488_s5 = sld [smem:[#allocation24_spill]]  ;;  %s2494_s29 = smov %s2128_s6 }
 0x32b   : > { %s2489_s13 = sld [smem:[#allocation25_spill]]  ;;  %s2491_s25 = smov %s2483_s23 }
 0x32c   : > { %s2495_s30 = smov %s1878_s8  ;;  %s2497_s10 = smov %s1894_s12 }
 0x32d   : > { %s2496_s8 = smov %s2485_s22  ;;  %26 = sbr.rel (!%p2376_p3) target bundleno = 21 (0x15), region = 122 }
 0x330   : > { %s2498_s12 = smov %s2488_s5 }
 0x332   :  { %1229 = vsyncpa [#allocation4], 1 }
 0x333   :  { %1231 = vsyncpa [#allocation4 + $0x1], 1 }
 0x334   :  { %1232 = vsyncpa [#allocation7], 1 }
 0x335   :  { %1234 = vsyncpa [#allocation7 + $0x1], 1 }
 0x336   :  { %1235 = vsyncpa [#allocation10], 1 }
 0x337   :  { %1236 = vsyncpa [#allocation5], 1 }
 0x338   :  { %1238 = vsyncpa [#allocation5 + $0x1], 1 }

</bundles_post_ra>
